<compile_context>
chip_gen: v7x
topology: tpu7x:2x2x1
jax: 0.10.0
libtpu: 0.0.40
codegen_flags: <defaults>
</compile_context>

<pallas_src>
import math
import functools

import jax
import jax.numpy as jnp
from jax.experimental import pallas as pl
from jax.experimental.pallas import tpu as pltpu

_SQRT2 = math.sqrt(2.0)


# ----------------------------------------------------------------------------
# Kernels
# ----------------------------------------------------------------------------
def _equal_linear_bias_kernel(x_ref, w_ref, b_ref, o_ref, *, fused_lrelu):
    """One row-tile of: out = x @ w + b, optionally leaky_relu(.,0.2)*sqrt(2).

    x_ref: (tm, in_dim)       activation tile
    w_ref: (in_dim, out_dim)  weight, already scaled by `scale`, pre-transposed
    b_ref: (1, out_dim)       bias, already multiplied by lr_mul
    o_ref: (tm, out_dim)
    """
    out = jnp.dot(x_ref[...], w_ref[...], preferred_element_type=jnp.float32)
    out = out + b_ref[...].astype(jnp.float32)
    if fused_lrelu:
        out = jnp.where(out >= 0, out, 0.2 * out) * _SQRT2
    o_ref[...] = out.astype(o_ref.dtype)


def _equal_linear_nobias_kernel(x_ref, w_ref, o_ref):
    o_ref[...] = jnp.dot(
        x_ref[...], w_ref[...], preferred_element_type=jnp.float32
    ).astype(o_ref.dtype)


def _copy_probe_kernel(x_ref, o_ref):
    o_ref[...] = x_ref[...]


# ----------------------------------------------------------------------------
# Helpers
# ----------------------------------------------------------------------------
def _pick_row_tile(batch: int) -> int:
    """MXU-filling row tile; keep >=2 grid steps when possible (v7x megacore)."""
    for t in (256, 128):
        if batch % t == 0 and batch // t >= 2:
            return t
    for t in (512, 256, 128, 64, 32, 16, 8):
        if batch % t == 0:
            return t
    return batch  # tiny batch: one full-batch tile (full-dim block is legal)


@functools.lru_cache(maxsize=None)
def _single_buffer_supported() -> bool:
    """True iff this Pallas build accepts pipeline_mode=pl.Buffered(1) on TPU."""
    try:
        spec = pl.BlockSpec((8, 128), lambda i: (0, 0),
                            pipeline_mode=pl.Buffered(1))
        fn = pl.pallas_call(
            _copy_probe_kernel,
            out_shape=jax.ShapeDtypeStruct((8, 128), jnp.float32),
            grid_spec=pltpu.PrefetchScalarGridSpec(
                num_scalar_prefetch=0,
                grid=(1,),
                in_specs=[spec],
                out_specs=pl.BlockSpec((8, 128), lambda i: (0, 0)),
            ),
        )
        jax.block_until_ready(fn(jnp.zeros((8, 128), jnp.float32)))
        return True
    except Exception:  # pragma: no cover - depends on installed jax/pallas
        return False


def _grid_invariant_spec(block_shape, index_map):
    """BlockSpec for an operand whose block never changes across the grid.

    Double-buffering a grid-invariant operand only wastes VMEM, so request a
    single buffer when supported; otherwise fall back to the default.
    """
    if _single_buffer_supported():
        return pl.BlockSpec(block_shape, index_map,
                            pipeline_mode=pl.Buffered(1))
    return pl.BlockSpec(block_shape, index_map)


def _validate_activation(activation, bias):
    if activation not in (None, "fused_lrelu"):
        raise ValueError(f"unsupported activation: {activation!r}")
    if activation is not None and bias is None:
        # PyTorch's forward computes `self.bias * self.lr_mul` and would fail.
        raise ValueError("activation='fused_lrelu' requires a bias "
                         "(as in the PyTorch EqualLinear)")


# ----------------------------------------------------------------------------
# Single EqualLinear
# ----------------------------------------------------------------------------
def equal_linear(x, weight, bias, *, lr_mul=1.0, activation=None, tm=None):
    """Pallas EqualLinear forward.

    x:      [batch, in_dim]
    weight: [out_dim, in_dim]  (PyTorch F.linear convention)
    bias:   [out_dim] or None
    """
    _validate_activation(activation, bias)

    batch, in_dim = x.shape
    out_dim, in_dim_w = weight.shape
    assert in_dim == in_dim_w

    scale = 1.0 / math.sqrt(in_dim) * lr_mul
    # Hoisted out of the grid loop: scale + transpose the weight ONCE so the
    # kernel's contraction is MXU-direct ([tm,K] @ [K,N]) with no in-kernel w.T.
    w_t = (weight * scale).T  # [in_dim, out_dim]

    if tm is None:
        tm = _pick_row_tile(batch)
    assert batch % tm == 0, "batch must be divisible by the row tile"
    grid = (batch // tm,)

    itemsize = jnp.dtype(x.dtype).itemsize
    flops = 2 * batch * in_dim * out_dim
    bytes_accessed = itemsize * (x.size + w_t.size + batch * out_dim
                                 + (out_dim if bias is not None else 0))
    cost = pl.CostEstimate(flops=flops, transcendentals=0,
                           bytes_accessed=bytes_accessed)

    x_spec = pl.BlockSpec((tm, in_dim), lambda i: (i, 0))
    w_spec = _grid_invariant_spec((in_dim, out_dim), lambda i: (0, 0))
    o_spec = pl.BlockSpec((tm, out_dim), lambda i: (i, 0))
    cparams = pltpu.CompilerParams(dimension_semantics=("parallel",))

    if bias is None:
        return pl.pallas_call(
            _equal_linear_nobias_kernel,
            out_shape=jax.ShapeDtypeStruct((batch, out_dim), x.dtype),
            grid_spec=pltpu.PrefetchScalarGridSpec(
                num_scalar_prefetch=0, grid=grid,
                in_specs=[x_spec, w_spec], out_specs=o_spec),
            compiler_params=cparams,
            cost_estimate=cost,
        )(x, w_t)

    # bias * lr_mul hoisted out of the loop.
    b2d = (bias * lr_mul).reshape(1, out_dim)
    b_spec = _grid_invariant_spec((1, out_dim), lambda i: (0, 0))
    kernel = functools.partial(_equal_linear_bias_kernel,
                               fused_lrelu=(activation == "fused_lrelu"))
    return pl.pallas_call(
        kernel,
        out_shape=jax.ShapeDtypeStruct((batch, out_dim), x.dtype),
        grid_spec=pltpu.PrefetchScalarGridSpec(
            num_scalar_prefetch=0, grid=grid,
            in_specs=[x_spec, w_spec, b_spec], out_specs=o_spec),
        compiler_params=cparams,
        cost_estimate=cost,
    )(x, w_t, b2d)


# ----------------------------------------------------------------------------
# Fused style-head bank (all GradualStyleEncoder EqualLinear heads at once)
# ----------------------------------------------------------------------------
def equal_linear_style_bank(x, weights, biases, *, lr_mul=1.0, activation=None,
                            tm=None):
    """All style-head EqualLinears in one pallas_call.

    x:       [n_styles, batch, in_dim]   per-head inputs (flattened conv feats)
    weights: [n_styles, out_dim, in_dim]
    biases:  [n_styles, out_dim]
    returns: [batch, n_styles, out_dim]  (== torch.stack(latents, dim=1))
    """
    _validate_activation(activation, biases)

    n_styles, batch, in_dim = x.shape
    ns_w, out_dim, in_dim_w = weights.shape
    assert ns_w == n_styles and in_dim_w == in_dim
    assert biases.shape == (n_styles, out_dim)

    scale = 1.0 / math.sqrt(in_dim) * lr_mul
    # Per-head weight scaled + transposed once: [n_styles, in_dim, out_dim].
    w_t = jnp.swapaxes(weights * scale, 1, 2)
    b3d = (biases * lr_mul).reshape(n_styles, 1, out_dim)

    if tm is None:
        tm = _pick_row_tile(batch)
    assert batch % tm == 0
    grid = (n_styles, batch // tm)

    itemsize = jnp.dtype(x.dtype).itemsize
    flops = 2 * n_styles * batch * in_dim * out_dim
    bytes_accessed = itemsize * (x.size + w_t.size + b3d.size
                                 + n_styles * batch * out_dim)
    cost = pl.CostEstimate(flops=flops, transcendentals=0,
                           bytes_accessed=bytes_accessed)

    kernel = functools.partial(_equal_linear_bias_kernel,
                               fused_lrelu=(activation == "fused_lrelu"))

    # Lane-dense output [batch, n_styles*out_dim]: each grid step writes a
    # full (tm, out_dim) tile whose last dim is a multiple of 128.
    out_flat = pl.pallas_call(
        kernel,
        out_shape=jax.ShapeDtypeStruct((batch, n_styles * out_dim), x.dtype),
        grid_spec=pltpu.PrefetchScalarGridSpec(
            num_scalar_prefetch=0,
            grid=grid,
            in_specs=[
                pl.BlockSpec((None, tm, in_dim), lambda s, i: (s, i, 0)),
                pl.BlockSpec((None, in_dim, out_dim), lambda s, i: (s, 0, 0)),
                pl.BlockSpec((None, 1, out_dim), lambda s, i: (s, 0, 0)),
            ],
            out_specs=pl.BlockSpec((tm, out_dim), lambda s, i: (i, s)),
        ),
        compiler_params=pltpu.CompilerParams(
            dimension_semantics=("parallel", "parallel")),
        cost_estimate=cost,
    )(x, w_t, b3d)
    return out_flat.reshape(batch, n_styles, out_dim)


# ----------------------------------------------------------------------------
# Pure-JAX references (mirror the PyTorch forward)
# ----------------------------------------------------------------------------
def equal_linear_ref(x, weight, bias, *, lr_mul=1.0, activation=None):
    in_dim = x.shape[-1]
    scale = 1.0 / math.sqrt(in_dim) * lr_mul
    out = x @ (weight * scale).T
    if activation == "fused_lrelu":
        out = out + bias * lr_mul
        out = jnp.where(out >= 0, out, 0.2 * out) * _SQRT2
    elif bias is not None:
        out = out + bias * lr_mul
    return out


def equal_linear_style_bank_ref(x, weights, biases, *, lr_mul=1.0,
                                activation=None):
    fn = lambda xh, wh, bh: equal_linear_ref(
        xh, wh, bh, lr_mul=lr_mul, activation=activation)
    out = jax.vmap(fn)(x, weights, biases)       # [n_styles, batch, out_dim]
    return jnp.transpose(out, (1, 0, 2))         # [batch, n_styles, out_dim]


# ----------------------------------------------------------------------------
# Demo / correctness check
# ----------------------------------------------------------------------------
if __name__ == "__main__":
    key = jax.random.PRNGKey(0)
    kx, kw, kxh, kwh, kbh = jax.random.split(key, 5)

    # ---- Single EqualLinear (the 512->512 linear inside GradualStyleBlock) ---
    batch, in_dim, out_dim = 256, 512, 512
    lr_mul = 0.5
    weight = jax.random.normal(kw, (out_dim, in_dim), jnp.float32) / lr_mul
    bias = jnp.full((out_dim,), 0.1, jnp.float32)
    x = jax.random.normal(kx, (batch, in_dim), jnp.float32)

    out_lin = jax.block_until_ready(
        equal_linear(x, weight, bias, lr_mul=lr_mul, activation=None))
    ref_lin = equal_linear_ref(x, weight, bias, lr_mul=lr_mul, activation=None)
    assert out_lin.shape == (batch, out_dim)
    assert jnp.allclose(out_lin, ref_lin, atol=2e-4, rtol=2e-4)

    out_act = jax.block_until_ready(
        equal_linear(x, weight, bias, lr_mul=lr_mul, activation="fused_lrelu"))
    ref_act = equal_linear_ref(x, weight, bias, lr_mul=lr_mul,
                               activation="fused_lrelu")
    assert jnp.allclose(out_act, ref_act, atol=2e-4, rtol=2e-4)

    out_nb = jax.block_until_ready(
        equal_linear(x, weight, None, lr_mul=lr_mul, activation=None))
    ref_nb = equal_linear_ref(x, weight, None, lr_mul=lr_mul, activation=None)
    assert jnp.allclose(out_nb, ref_nb, atol=2e-4, rtol=2e-4)

    # ---- Fused style-head bank: 18 heads of 512x512 (GradualStyleEncoder,
    #      size=256), image batch = 2; each head gets its own flattened
    #      GradualStyleBlock conv feature. ----
    n_styles, img_batch = 18, 2
    x_heads = jax.random.normal(kxh, (n_styles, img_batch, in_dim), jnp.float32)
    w_heads = jax.random.normal(kwh, (n_styles, out_dim, in_dim), jnp.float32)
    b_heads = 0.01 * jax.random.normal(kbh, (n_styles, out_dim), jnp.float32)

    out_bank = jax.block_until_ready(
        equal_linear_style_bank(x_heads, w_heads, b_heads,
                                lr_mul=1.0, activation=None))
    ref_bank = equal_linear_style_bank_ref(x_heads, w_heads, b_heads,
                                           lr_mul=1.0, activation=None)
    assert out_bank.shape == (img_batch, n_styles, out_dim)
    assert jnp.allclose(out_bank, ref_bank, atol=2e-4, rtol=2e-4)

    print("KERNEL_OK")
</pallas_src>

<mosaic_0001>
module attributes {stable_mosaic.version = 11 : i64} {
  func.func @_copy_probe_kernel(%arg0: i32, %arg1: memref<8x128xf32, #tpu.memory_space<vmem>>, %arg2: memref<8x128xf32, #tpu.memory_space<vmem>>) attributes {dimension_semantics = [#tpu.dimension_semantics<arbitrary>], iteration_bounds = array<i64: 1>, scalar_prefetch = 0 : i64, scratch_operands = 0 : i64, tpu.core_type = #tpu.core_type<tc>, window_params = [{pipeline_mode = #tpu.pipeline_mode<synchronous>, transform_indices = @transform_0, window_bounds = array<i64: 8, 128>}, {pipeline_mode = #tpu.pipeline_mode<synchronous>, transform_indices = @transform_1, window_bounds = array<i64: 8, 128>}]} {
    %c0 = arith.constant 0 : index
    %c0_0 = arith.constant 0 : index
    %0 = vector.load %arg1[%c0, %c0_0] : memref<8x128xf32, #tpu.memory_space<vmem>>, vector<8x128xf32>
    %c0_1 = arith.constant 0 : index
    %c0_2 = arith.constant 0 : index
    %1 = vector.load %arg2[%c0_1, %c0_2] : memref<8x128xf32, #tpu.memory_space<vmem>>, vector<8x128xf32>
    tpu.vector_store %arg2[%c0_1, %c0_2], %0 {strides = array<i32>} : memref<8x128xf32, #tpu.memory_space<vmem>>, vector<8x128xf32>,
    return
  }
  func.func @transform_0(%arg0: i32) -> (i32, i32) {
    %c0_i32 = arith.constant 0 : i32
    %c0_i32_0 = arith.constant 0 : i32
    %c0_i32_1 = arith.constant 0 : i32
    return %c0_i32, %c0_i32_0 : i32, i32
  }
  func.func @transform_1(%arg0: i32) -> (i32, i32) {
    %c0_i32 = arith.constant 0 : i32
    %c0_i32_0 = arith.constant 0 : i32
    %c0_i32_1 = arith.constant 0 : i32
    return %c0_i32, %c0_i32_0 : i32, i32
  }
}

module attributes {stable_mosaic.version = 11 : i64} {
  func.func @_equal_linear_bias_kernel(%arg0: i32, %arg1: memref<128x512xf32, #tpu.memory_space<vmem>>, %arg2: memref<512x512xf32, #tpu.memory_space<vmem>>, %arg3: memref<1x512xf32, #tpu.memory_space<vmem>>, %arg4: memref<128x512xf32, #tpu.memory_space<vmem>>) attributes {dimension_semantics = [#tpu.dimension_semantics<parallel>], iteration_bounds = array<i64: 2>, scalar_prefetch = 0 : i64, scratch_operands = 0 : i64, tpu.core_type = #tpu.core_type<tc>, window_params = [{transform_indices = @transform_0, window_bounds = array<i64: 128, 512>}, {pipeline_mode = #tpu.pipeline_mode<synchronous>, transform_indices = @transform_1, window_bounds = array<i64: 512, 512>}, {pipeline_mode = #tpu.pipeline_mode<synchronous>, transform_indices = @transform_2, window_bounds = array<i64: 1, 512>}, {transform_indices = @transform_3, window_bounds = array<i64: 128, 512>}]} {
    %c0 = arith.constant 0 : index
    %c0_0 = arith.constant 0 : index
    %0 = vector.load %arg1[%c0, %c0_0] : memref<128x512xf32, #tpu.memory_space<vmem>>, vector<128x512xf32>
    %c0_1 = arith.constant 0 : index
    %c0_2 = arith.constant 0 : index
    %1 = vector.load %arg2[%c0_1, %c0_2] : memref<512x512xf32, #tpu.memory_space<vmem>>, vector<512x512xf32>
    %cst = arith.constant dense<0.000000e+00> : vector<128x512xf32>
    %2 = tpu.matmul %0, %1, %cst {dimension_numbers = #tpu.dot_dimension_numbers<[1], [0], [0], [1], [0, 0, 1, 1], [], []>} : vector<128x512xf32>, vector<512x512xf32>, vector<128x512xf32> -> vector<128x512xf32>
    %c0_3 = arith.constant 0 : index
    %c0_4 = arith.constant 0 : index
    %3 = vector.load %arg3[%c0_3, %c0_4] : memref<1x512xf32, #tpu.memory_space<vmem>>, vector<1x512xf32>
    %4 = vector.broadcast %3 : vector<1x512xf32> to vector<128x512xf32>
    %5 = arith.addf %2, %4 : vector<128x512xf32>
    %c0_5 = arith.constant 0 : index
    %c0_6 = arith.constant 0 : index
    %6 = vector.load %arg4[%c0_5, %c0_6] : memref<128x512xf32, #tpu.memory_space<vmem>>, vector<128x512xf32>
    tpu.vector_store %arg4[%c0_5, %c0_6], %5 {strides = array<i32>} : memref<128x512xf32, #tpu.memory_space<vmem>>, vector<128x512xf32>,
    return
  }
  func.func @transform_0(%arg0: i32) -> (i32, i32) {
    %c0_i32 = arith.constant 0 : i32
    %c0_i32_0 = arith.constant 0 : i32
    return %arg0, %c0_i32 : i32, i32
  }
  func.func @transform_1(%arg0: i32) -> (i32, i32) {
    %c0_i32 = arith.constant 0 : i32
    %c0_i32_0 = arith.constant 0 : i32
    %c0_i32_1 = arith.constant 0 : i32
    return %c0_i32, %c0_i32_0 : i32, i32
  }
  func.func @transform_2(%arg0: i32) -> (i32, i32) {
    %c0_i32 = arith.constant 0 : i32
    %c0_i32_0 = arith.constant 0 : i32
    %c0_i32_1 = arith.constant 0 : i32
    return %c0_i32, %c0_i32_0 : i32, i32
  }
  func.func @transform_3(%arg0: i32) -> (i32, i32) {
    %c0_i32 = arith.constant 0 : i32
    %c0_i32_0 = arith.constant 0 : i32
    return %arg0, %c0_i32 : i32, i32
  }
}

</mosaic_0001>

<bundles_post_ra>
// kernel: tpu_custom_call.1
= control target key start
LH: loop header
LB: loop body
LE: loop exit
PB: predicated region body
PF: predicated region fallthrough
CT: control target
= control target key end

     0   :  { %6 = vsyncpa [#allocation3], 0  ;;  %s124_s0 = inlined_call_operand.hbm [shape: f32[8,128], index: 0, kind: input, shape index: {}]   ;;  %s125_s1 = inlined_call_operand.hbm [shape: f32[8,128], index: 1, kind: output, shape index: {}]  }
   0x1   :  { %7 = vsyncpa [#allocation4], 0  ;;  %s88_s6 = smov [#allocation2]   ;;  %s40_s10 = scalar_lea.hbm %s124_s0, 128 }
   0x2   :  { %s14_s7 = sshll.u32 %s88_s6, 4  ;;  %p41_p0 = scmp.ne.s32.totalorder %s124_s0, %s40_s10  ;;  %s15_s7 = int_to_ptr.vmem [resolvable:$true] %s14_s7 }
   0x3   :  { %p44_p1 = scmp.lt.u32.totalorder %s40_s10, %s124_s0 }
   0x5   :  { %p46_p2 = pnand %p44_p1, %p41_p0 }
   0x7   :  { %49 = shalt.err (!%p46_p2)
}
   0x8   :  { %s50_s15 = scalar_lea.vmem %s15_s7, 128  ;;  %p55_p4 = scmp.lt.s32.totalorder %s15_s7, %s15_s7 }
   0x9   :  { %p51_p3 = scmp.ne.s32.totalorder %s15_s7, %s50_s15  ;;  %p56_p5 = scmp.lt.s32.totalorder %s50_s15, %s50_s15 }
   0xb   :  { %p57_p6 = por %p56_p5, %p55_p4 }
   0xd   :  { %p58_p7 = pnand %p57_p6, %p51_p3 }
   0xf   :  { %61 = shalt.err (!%p58_p7)
}
  0x10   :  { %17 = dma.hbm_to_vmem [thread:$0]  %s124_s0, 128, %s15_s7, [#allocation3]  }
  0x11   :  { %84 = dma.done.wait [#allocation3], 128  }
  0x12   :  { %85 = vsyncadd [#allocation3], 4294967168  ;;  %s89_s18 = smov [#allocation5]   ;;  %v21_v0 = vld [vmem:[#allocation2] sm:$0xff] }
  0x13   :  { %s29_s19 = sshll.u32 %s89_s18, 4  ;;  %22 = vst [vmem:[#allocation5] sm:$0xff] %v21_v0  ;;  %s30_s19 = int_to_ptr.vmem [resolvable:$true] %s29_s19 }
  0x14   :  { %s62_s20 = scalar_lea.vmem %s30_s19, 128  ;;  %p67_p9 = scmp.lt.s32.totalorder %s30_s19, %s30_s19 }
  0x15   :  { %p63_p8 = scmp.ne.s32.totalorder %s30_s19, %s62_s20  ;;  %p68_p10 = scmp.lt.s32.totalorder %s62_s20, %s62_s20 }
  0x17   :  { %p69_p11 = por %p68_p10, %p67_p9 }
  0x19   :  { %p70_p12 = pnand %p69_p11, %p63_p8 }
  0x1b   :  { %73 = shalt.err (!%p70_p12)
}
  0x1c   :  { %s74_s23 = scalar_lea.hbm %s125_s1, 128 }
  0x1d   :  { %p75_p13 = scmp.ne.s32.totalorder %s125_s1, %s74_s23  ;;  %p78_p0 = scmp.lt.u32.totalorder %s74_s23, %s125_s1 }
  0x1f   :  { %p80_p1 = pnand %p78_p0, %p75_p13 }
  0x21   :  { %83 = shalt.err (!%p80_p1)
}
  0x22   :  { %32 = dma.vmem_to_hbm [thread:$0]  %s30_s19, 128, %s125_s1, [#allocation4]  }
  0x23   :  { %86 = dma.done.wait [#allocation4], 128  }
  0x24   :  { %87 = vsyncadd [#allocation4], 4294967168 }
  0x25   :  { %36 = vsyncpa [#allocation3], 1 }
  0x26   :  { %37 = vsyncpa [#allocation4], 1 }

// kernel: tpu_custom_call.1
= control target key start
LH: loop header
LB: loop body
LE: loop exit
PB: predicated region body
PF: predicated region fallthrough
CT: control target
= control target key end

     0   :  { %8 = vsyncpa [#allocation3], 0  ;;  %s2398_s0 = inlined_call_operand.hbm [shape: f32[256,512], index: 0, kind: input, shape index: {}]   ;;  %s2399_s1 = inlined_call_operand.hbm [shape: f32[512,512], index: 1, kind: input, shape index: {}]   ;;  %s2400_s2 = inlined_call_operand.vmem [shape: f32[1,512], index: 2, kind: input, shape index: {}]   ;;  %s2401_s3 = inlined_call_operand.hbm [shape: f32[256,512], index: 3, kind: output, shape index: {}]  }
   0x1   :  { %10 = vsyncpa [#allocation3 + $0x1], 0 }
   0x2   :  { %11 = vsyncpa [#allocation6], 0 }
   0x3   :  { %12 = vsyncpa [#allocation4], 0 }
   0x4   :  { %14 = vsyncpa [#allocation4 + $0x1], 0  ;;  %s1979_s12 = smov 0   ;;  %s1981_s13 = smov 0  }
   0x5   :  { %s1983_s14 = smov 0   ;;  %s1985_s15 = smov 0  }
   0x6 LB: > { %s2000_s16 = sadd.s32 4294967295, %s1950_s15   ;;  %s1355_s17 = sadd.s32 4294967294, %s1950_s15   ;;  %s1950_s15 = sphi %s1985_s15, %s2421_s15   ;;  %s1946_s14 = sphi %s1983_s14, %s2420_s14   ;;  %s1942_s13 = sphi %s1981_s13, %s2419_s13   ;;  %s1938_s12 = sphi %s1979_s12, %s2418_s12  }
   0x7   : > { %p40_p0 = scmp.ne.s32.totalorder %s1942_s13, %s1938_s12  ;;  %p2402_p1 = scmp.eq.s32.totalorder %s2000_s16, 0 }
   0x8   : > { %p112_p3 = scmp.eq.s32.totalorder %s1355_s17, 1  ;;  %p1356_p5 = scmp.ge.s32.totalorder %s1950_s15, 1 }
   0x9   : > { %p2009_p4 = por %p2402_p1, %p40_p0  ;;  %p119_p7 = scmp.lt.s32.totalorder %s1950_s15, 3 }
   0xa   : > { %p2014_p6 = por %p112_p3, %p40_p0  ;;  %s1952_s21 = smov [#allocation5]  }
   0xb   : > { %s2405_s18 = scalar_select %p2009_p4, 1, 0 }
   0xc   : > { %s2406_s19 = scalar_select %p2014_p6, 1, 0 }
   0xd   : > { %p2019_p8 = pnand %p1356_p5, %p119_p7  ;;  %s131_s22 = sshll.u32 %s1952_s21, 4  ;;  %s2023_s22 = int_to_ptr.vmem [resolvable:$true] %s131_s22 }
   0xe   : > { %s2035_s24 = sadd.s32 1, %s1950_s15   ;;  %s27_s25 = sadd.s32 1, %s1946_s14 }
   0xf   : > { %s2407_s20 = scalar_select %p2019_p8, 1, 0 }
  0x10   : > { %p1769_p9 = pneg %p2019_p8  ;;  %s24_s26 = ssub.s32 %s1950_s15, %s2035_s24 }
  0x11   : > { %s1822_s29 = scalar_lea.hbm %s2399_s1, 32768 }
  0x12   : > { %p2030_p11 = pnand %p1769_p9, %p2402_p1  ;;  %p1823_p12 = scmp.ne.s32.totalorder %s2399_s1, %s1822_s29 }
  0x13   : > { %p1829_p5 = scmp.lt.u32.totalorder %s1822_s29, %s2399_s1 }
  0x14   : > { %p1824_p13 = pneg %p2030_p11 }
  0x16   : > { %p1825_p0 = pnand %p1824_p13, %p1823_p12 }
  0x18   : > { %p1826_p3 = pneg %p1825_p0 }
  0x1a   : > { %p1831_p7 = pnand %p1829_p5, %p1826_p3 }
  0x1c   : > { %1834 = shalt.err (!%p1831_p7)
}
  0x1d   : > { %s1835_s7 = scalar_lea.vmem %s2023_s22, 32768  ;;  %p1843_p2 = scmp.lt.s32.totalorder %s2023_s22, %s2023_s22 }
  0x1e   : > { %p1836_p9 = scmp.ne.s32.totalorder %s2023_s22, %s1835_s7  ;;  %p1844_p6 = scmp.lt.s32.totalorder %s1835_s7, %s1835_s7 }
  0x20   : > { %p1838_p10 = pnand %p1836_p9, %p1824_p13  ;;  %p1845_p4 = por %p1844_p6, %p1843_p2 }
  0x22   : > { %p1839_p1 = pneg %p1838_p10 }
  0x24   : > { %p1846_p8 = pnand %p1845_p4, %p1839_p1 }
  0x26   : > { %1849 = shalt.err (!%p1846_p8)
}
  0x27   : > { %s1953_s8 = smov 512   ;;  %s1954_s9 = smov 32  }
  0x28   : > { %1772 = dma.hbm_to_vmem [thread:$0]  (!%p2030_p11), %s2399_s1, 32768, %s2023_s22, [#allocation6], %s1953_s8, %s1953_s8, %s1954_s9  }
  0x29   : > { %p25_p1 = scmp.eq.s32.totalorder %s24_s26, 0  ;;  %p34_p2 = scmp.ne.s32.totalorder %s1946_s14, %s1942_s13 }
  0x2a   : > { %p35_p4 = scmp.eq.s32.totalorder %s1950_s15, 0  ;;  %p1782_p6 = scmp.lt.s32.totalorder %s1950_s15, 2 }
  0x2b   : > { %s2069_s17 = scalar_select %p25_p1, %s1946_s14, %s27_s25  }
  0x2c   : > { %p36_p8 = por %p35_p4, %p34_p2  ;;  %p2409_p10 = scmp.eq.s32.totalorder %s2000_s16, 1 }
  0x2d   : > { %s148_s23 = sand.u32 1, %s1946_s14   ;;  %s1374_s27 = sshll.u32 %s1950_s15, 13 }
  0x2e   : > { %p2073_p12 = por %p2409_p10, %p34_p2  ;;  %s1359_s28 = sshll.u32 %s148_s23, 9 }
  0x2f   : > { %s2082_s4 = scalar_lea.hbm %s2398_s0, %s1374_s27  ;;  %s152_s22 = scalar_lea.vmem [#allocation2], %s1359_s28 }
  0x30   : > { %s160_s25 = sshll.u32 %s152_s22, 4  ;;  %p2084_p11 = pnand %p1782_p6, %p36_p8  ;;  %s2088_s25 = int_to_ptr.vmem [resolvable:$true] %s160_s25 }
  0x31   : > { %s2090_s5 = scalar_lea.sflag [#allocation3], %s148_s23  ;;  %s1850_s6 = scalar_lea.hbm %s2082_s4, 8192 }
  0x32   : > { %p1851_p13 = scmp.ne.s32.totalorder %s2082_s4, %s1850_s6  ;;  %p1852_p0 = pneg %p2084_p11 }
  0x33   : > { %s1855_s11 = scalar_lea.hbm %s2398_s0, 16384  ;;  %p1856_p7 = scmp.lt.u32.totalorder %s2082_s4, %s2398_s0 }
  0x34   : > { %p1853_p3 = pnand %p1852_p0, %p1851_p13  ;;  %p1857_p9 = scmp.lt.u32.totalorder %s1855_s11, %s1850_s6 }
  0x35   : > { %p1859_p2 = scmp.lt.u32.totalorder %s1850_s6, %s2082_s4 }
  0x36   : > { %p1854_p5 = pneg %p1853_p3  ;;  %p1858_p1 = por %p1857_p9, %p1856_p7 }
  0x38   : > { %p1860_p4 = por %p1859_p2, %p1858_p1 }
  0x3a   : > { %p1861_p6 = pnand %p1860_p4, %p1854_p5 }
  0x3c   : > { %1864 = shalt.err (!%p1861_p6)
}
  0x3d   : > { %s1865_s23 = scalar_lea.vmem %s2088_s25, 8192  ;;  %s1955_s29 = smov [#allocation2]  }
  0x3e   : > { %p1866_p8 = scmp.ne.s32.totalorder %s2088_s25, %s1865_s23  ;;  %s1870_s30 = sshll.u32 %s1955_s29, 4  ;;  %s1871_s30 = int_to_ptr.vmem [resolvable:$false] %s1870_s30 }
  0x3f   : > { %s1872_s22 = scalar_lea.vmem %s1871_s30, 16384  ;;  %p1873_p3 = scmp.lt.s32.totalorder %s2088_s25, %s1871_s30 }
  0x40   : > { %p1868_p10 = pnand %p1866_p8, %p1852_p0  ;;  %p1874_p7 = scmp.lt.s32.totalorder %s1872_s22, %s1865_s23 }
  0x42   : > { %p1869_p13 = pneg %p1868_p10  ;;  %p1875_p9 = por %p1874_p7, %p1873_p3 }
  0x44   : > { %p1876_p1 = pnand %p1875_p9, %p1869_p13 }
  0x46   : > { %1879 = shalt.err (!%p1876_p1)
}
  0x47   : > { %1776 = dma.hbm_to_vmem [thread:$0]  (!%p2084_p11), %s2082_s4, 8192, %s2088_s25, %s2090_s5, %s1953_s8, %s1953_s8, %s1954_s9  }
  0x48   : > { %p2412_p0 = scmp.ne.s32.totalorder %s2407_s20, 0 }
  0x49   : > { %s2124_s6 = sand.u32 (!%p2412_p0), 1, %s1942_s13   ;;  %p2413_p5 = scmp.ne.s32.totalorder (!%p2412_p0), %s2405_s18, 0 }
  0x4a   : > { %172 = sbr.rel (%p2412_p0) target bundleno = 508 (0x1fc), region = 32  ;;  %s1364_s7 = sshll.u32 (!%p2412_p0), %s2124_s6, 9 }
  0x4b   : > { %s175_s10 = scalar_lea.sflag (!%p2412_p0), [#allocation3], %s2124_s6  ;;  %s2130_s26 = scalar_lea.vmem (!%p2412_p0), [#allocation2], %s1364_s7 }
  0x51   : > { %1925 = dma.done.wait (%p2413_p5), %s175_s10, 8192  }
  0x52   : > { %1927 = vsyncadd (%p2413_p5), %s175_s10, 4294959104  ;;  %p2414_p11 = scmp.eq.s32.totalorder %s2000_s16, 0 }
  0x54   : > { %1929 = dma.done.wait (%p2414_p11), [#allocation6], 32768   ;;  %p2415_p2 = pmov %p2414_p11 }
  0x55   : > { %v272_v0 = vld [vmem:[#allocation5 + $0x8] sm:$0xff]  ;;  %v274_v2 = vld [vmem:[#allocation5 + $0x18] sm:$0xff]  ;;  %v271_v5 = vld [vmem:[#allocation5] sm:$0xff]  ;;  %s2220_s8 = scalar_lea.vmem [#allocation7], %s1364_s7  ;;  %s1376_s9 = sshll.u32 %s2000_s16, 13 }
  0x56   : > { %1931 = vsyncadd (%p2415_p2), [#allocation6], 4294934528  ;;  %v276_v1 = vld [vmem:[#allocation5 + $0x28] sm:$0xff]  ;;  %v278_v4 = vld [vmem:[#allocation5 + $0x38] sm:$0xff]  ;;  %s1272_s4 = sshll.u32 %s2220_s8, 4  ;;  %s2347_s5 = scalar_lea.hbm %s2401_s3, %s1376_s9  ;;  %s2349_s4 = int_to_ptr.vmem [resolvable:$true] %s1272_s4 }
  0x57   : > { %v1377_v3 = vpack.c.bf16 %v276_v1, %v272_v0  ;;  %v275_v6 = vld [vmem:[#allocation5 + $0x20] sm:$0xff]  ;;  %v1505_v7 = vpack.c.bf16 %v278_v4, %v274_v2  ;;  %v273_v9 = vld [vmem:[#allocation5 + $0x10] sm:$0xff]  ;;  %v280_v11 = vld [vmem:[#allocation5 + $0x48] sm:$0xff]  ;;  %s1258_s11 = scalar_lea.sflag [#allocation4], %s2124_s6  ;;  %s1880_s27 = scalar_lea.vmem %s2349_s4, 8192 }
  0x58   : > { %v1379_v8 = vpack.c.bf16 %v275_v6, %v271_v5  ;;  %v277_v10 = vld [vmem:[#allocation5 + $0x30] sm:$0xff]  ;;  %v284_v13 = vld [vmem:[#allocation5 + $0x68] sm:$0xff]  ;;  %v282_v14 = vld [vmem:[#allocation5 + $0x58] sm:$0xff]  ;;  %p1881_p4 = scmp.ne.s32.totalorder %s2349_s4, %s1880_s27  ;;  %s1956_s28 = smov [#allocation7]  }
  0x59   : > { %1378 = vmatprep.subr.bf16.mxu0 %v1377_v3  ;;  %v1507_v12 = vpack.c.bf16 %v277_v10, %v273_v9  ;;  %v286_v15 = vld [vmem:[#allocation5 + $0x78] sm:$0xff]  ;;  %1506 = vmatprep.subr.bf16.mxu1 %v1505_v7  ;;  %v1381_v16 = vpack.c.bf16 %v284_v13, %v280_v11  ;;  %v279_v18 = vld [vmem:[#allocation5 + $0x40] sm:$0xff]  ;;  %v281_v20 = vld [vmem:[#allocation5 + $0x50] sm:$0xff]  ;;  %s1884_s23 = sshll.u32 %s1956_s28, 4  ;;  %s1885_s23 = int_to_ptr.vmem [resolvable:$false] %s1884_s23 }
  0x5a   : > { %1380 = vmatpush1.bf16.msra.mxu0 %v1379_v8  ;;  %v1509_v17 = vpack.c.bf16 %v286_v15, %v282_v14  ;;  %v283_v19 = vld [vmem:[#allocation5 + $0x60] sm:$0xff]  ;;  %v285_v22 = vld [vmem:[#allocation5 + $0x70] sm:$0xff]  ;;  %v288_v23 = vld [vmem:[#allocation5 + $0x88] sm:$0xff]  ;;  %p1882_p6 = pnand %p1881_p4, %p2073_p12  ;;  %s1886_s29 = scalar_lea.vmem %s1885_s23, 16384 }
  0x5b   : > { %1508 = vmatpush1.bf16.msra.mxu1 %v1507_v12  ;;  %v1383_v21 = vpack.c.bf16 %v283_v19, %v279_v18  ;;  %v292_v24 = vld [vmem:[#allocation5 + $0xa8] sm:$0xff]  ;;  %1382 = vmatprep.subr.bf16.mxu0 %v1381_v16  ;;  %v1511_v25 = vpack.c.bf16 %v285_v22, %v281_v20  ;;  %v290_v27 = vld [vmem:[#allocation5 + $0x98] sm:$0xff]  ;;  %v287_v29 = vld [vmem:[#allocation5 + $0x80] sm:$0xff]  ;;  %p1887_p10 = scmp.lt.s32.totalorder %s2349_s4, %s1885_s23  ;;  %p1888_p13 = scmp.lt.s32.totalorder %s1886_s29, %s1880_s27 }
  0x5c   : > { %1510 = vmatprep.subr.bf16.mxu1 %v1509_v17  ;;  %v1385_v26 = vpack.c.bf16 %v292_v24, %v288_v23  ;;  %v294_v28 = vld [vmem:[#allocation5 + $0xb8] sm:$0xff]  ;;  %v291_v31 = vld [vmem:[#allocation5 + $0xa0] sm:$0xff]  ;;  %v289_v32 = vld [vmem:[#allocation5 + $0x90] sm:$0xff]  ;;  %p1883_p8 = pneg %p1882_p6 }
  0x5d   : > { %v1513_v30 = vpack.c.bf16 %v294_v28, %v290_v27  ;;  %v293_v33 = vld [vmem:[#allocation5 + $0xb0] sm:$0xff]  ;;  %v1387_v34 = vpack.c.bf16 %v291_v31, %v287_v29  ;;  %v296_v35 = vld [vmem:[#allocation5 + $0xc8] sm:$0xff]  ;;  %v298_v37 = vld [vmem:[#allocation5 + $0xd8] sm:$0xff]  ;;  %p1889_p3 = por %p1888_p13, %p1887_p10 }
  0x5e   : > { %1384 = vmatpush1.bf16.msra.mxu0 %v1383_v21  ;;  %v300_v36 = vld [vmem:[#allocation5 + $0xe8] sm:$0xff]  ;;  %v1515_v38 = vpack.c.bf16 %v293_v33, %v289_v32  ;;  %v302_v40 = vld [vmem:[#allocation5 + $0xf8] sm:$0xff]  ;;  %v295_v41 = vld [vmem:[#allocation5 + $0xc0] sm:$0xff] }
  0x5f   : > { %1512 = vmatpush1.bf16.msra.mxu1 %v1511_v25  ;;  %1386 = vmatprep.subr.bf16.mxu0 %v1385_v26  ;;  %v1389_v39 = vpack.c.bf16 %v300_v36, %v296_v35  ;;  %v299_v42 = vld [vmem:[#allocation5 + $0xe0] sm:$0xff]  ;;  %v1517_v43 = vpack.c.bf16 %v302_v40, %v298_v37  ;;  %v297_v44 = vld [vmem:[#allocation5 + $0xd0] sm:$0xff]  ;;  %v304_v46 = vld [vmem:[#allocation5 + $0x108] sm:$0xff]  ;;  %p1890_p7 = pnand %p1889_p3, %p1883_p8 }
  0x60   : > { %1514 = vmatprep.subr.bf16.mxu1 %v1513_v30  ;;  %v301_v45 = vld [vmem:[#allocation5 + $0xf0] sm:$0xff]  ;;  %v308_v47 = vld [vmem:[#allocation5 + $0x128] sm:$0xff]  ;;  %v306_v48 = vld [vmem:[#allocation5 + $0x118] sm:$0xff]  ;;  %v1391_v50 = vpack.c.bf16 %v299_v42, %v295_v41 }
  0x61   : > { %v310_v49 = vld [vmem:[#allocation5 + $0x138] sm:$0xff]  ;;  %v1519_v51 = vpack.c.bf16 %v301_v45, %v297_v44  ;;  %v1393_v52 = vpack.c.bf16 %v308_v47, %v304_v46  ;;  %v303_v53 = vld [vmem:[#allocation5 + $0x100] sm:$0xff]  ;;  %v305_v55 = vld [vmem:[#allocation5 + $0x110] sm:$0xff] }
  0x62   : > { %1388 = vmatpush1.bf16.msra.mxu0 %v1387_v34  ;;  %v307_v54 = vld [vmem:[#allocation5 + $0x120] sm:$0xff]  ;;  %v1521_v56 = vpack.c.bf16 %v310_v49, %v306_v48  ;;  %v309_v57 = vld [vmem:[#allocation5 + $0x130] sm:$0xff]  ;;  %v312_v58 = vld [vmem:[#allocation5 + $0x148] sm:$0xff] }
  0x63   : > { %1516 = vmatpush1.bf16.msra.mxu1 %v1515_v38  ;;  %1390 = vmatprep.subr.bf16.mxu0 %v1389_v39  ;;  %v316_v59 = vld [vmem:[#allocation5 + $0x168] sm:$0xff]  ;;  %v314_v60 = vld [vmem:[#allocation5 + $0x158] sm:$0xff]  ;;  %v1395_v62 = vpack.c.bf16 %v307_v54, %v303_v53  ;;  %v1523_v63 = vpack.c.bf16 %v309_v57, %v305_v55  ;;  %v311_v1 = vld [vmem:[#allocation5 + $0x140] sm:$0xff] }
  0x64   : > { %1518 = vmatprep.subr.bf16.mxu1 %v1517_v43  ;;  %v318_v61 = vld [vmem:[#allocation5 + $0x178] sm:$0xff]  ;;  %v1397_v0 = vpack.c.bf16 %v316_v59, %v312_v58  ;;  %v315_v2 = vld [vmem:[#allocation5 + $0x160] sm:$0xff]  ;;  %v313_v3 = vld [vmem:[#allocation5 + $0x150] sm:$0xff] }
  0x65   : > { %v1525_v4 = vpack.c.bf16 %v318_v61, %v314_v60  ;;  %v317_v5 = vld [vmem:[#allocation5 + $0x170] sm:$0xff]  ;;  %v320_v6 = vld [vmem:[#allocation5 + $0x188] sm:$0xff]  ;;  %v322_v8 = vld [vmem:[#allocation5 + $0x198] sm:$0xff]  ;;  %v1399_v10 = vpack.c.bf16 %v315_v2, %v311_v1 }
  0x66   : > { %1392 = vmatpush1.bf16.msra.mxu0 %v1391_v50  ;;  %v324_v7 = vld [vmem:[#allocation5 + $0x1a8] sm:$0xff]  ;;  %v326_v9 = vld [vmem:[#allocation5 + $0x1b8] sm:$0xff]  ;;  %v1527_v11 = vpack.c.bf16 %v317_v5, %v313_v3  ;;  %v319_v13 = vld [vmem:[#allocation5 + $0x180] sm:$0xff] }
  0x67   : > { %1520 = vmatpush1.bf16.msra.mxu1 %v1519_v51  ;;  %1394 = vmatprep.subr.bf16.mxu0 %v1393_v52  ;;  %v1401_v12 = vpack.c.bf16 %v324_v7, %v320_v6  ;;  %v323_v14 = vld [vmem:[#allocation5 + $0x1a0] sm:$0xff]  ;;  %v321_v15 = vld [vmem:[#allocation5 + $0x190] sm:$0xff]  ;;  %v1529_v16 = vpack.c.bf16 %v326_v9, %v322_v8  ;;  %v328_v18 = vld [vmem:[#allocation5 + $0x1c8] sm:$0xff] }
  0x68   : > { %1522 = vmatprep.subr.bf16.mxu1 %v1521_v56  ;;  %v325_v17 = vld [vmem:[#allocation5 + $0x1b0] sm:$0xff]  ;;  %v332_v19 = vld [vmem:[#allocation5 + $0x1e8] sm:$0xff]  ;;  %v330_v20 = vld [vmem:[#allocation5 + $0x1d8] sm:$0xff]  ;;  %v1403_v22 = vpack.c.bf16 %v323_v14, %v319_v13 }
  0x69   : > { %v334_v21 = vld [vmem:[#allocation5 + $0x1f8] sm:$0xff]  ;;  %v1531_v23 = vpack.c.bf16 %v325_v17, %v321_v15  ;;  %v1405_v24 = vpack.c.bf16 %v332_v19, %v328_v18  ;;  %v327_v25 = vld [vmem:[#allocation5 + $0x1c0] sm:$0xff]  ;;  %v329_v27 = vld [vmem:[#allocation5 + $0x1d0] sm:$0xff] }
  0x6a   : > { %1396 = vmatpush1.bf16.msra.mxu0 %v1395_v62  ;;  %v331_v26 = vld [vmem:[#allocation5 + $0x1e0] sm:$0xff]  ;;  %v1533_v28 = vpack.c.bf16 %v334_v21, %v330_v20  ;;  %v333_v29 = vld [vmem:[#allocation5 + $0x1f0] sm:$0xff]  ;;  %v336_v30 = vld [vmem:[#allocation5 + $0x208] sm:$0xff] }
  0x6b   : > { %1524 = vmatpush1.bf16.msra.mxu1 %v1523_v63  ;;  %1398 = vmatprep.subr.bf16.mxu0 %v1397_v0  ;;  %v340_v31 = vld [vmem:[#allocation5 + $0x228] sm:$0xff]  ;;  %v338_v32 = vld [vmem:[#allocation5 + $0x218] sm:$0xff]  ;;  %v1407_v34 = vpack.c.bf16 %v331_v26, %v327_v25  ;;  %v1535_v35 = vpack.c.bf16 %v333_v29, %v329_v27  ;;  %v335_v37 = vld [vmem:[#allocation5 + $0x200] sm:$0xff] }
  0x6c   : > { %1526 = vmatprep.subr.bf16.mxu1 %v1525_v4  ;;  %v342_v33 = vld [vmem:[#allocation5 + $0x238] sm:$0xff]  ;;  %v1409_v36 = vpack.c.bf16 %v340_v31, %v336_v30  ;;  %v339_v38 = vld [vmem:[#allocation5 + $0x220] sm:$0xff]  ;;  %v337_v39 = vld [vmem:[#allocation5 + $0x210] sm:$0xff] }
  0x6d   : > { %v1537_v40 = vpack.c.bf16 %v342_v33, %v338_v32  ;;  %v341_v41 = vld [vmem:[#allocation5 + $0x230] sm:$0xff]  ;;  %v344_v42 = vld [vmem:[#allocation5 + $0x248] sm:$0xff]  ;;  %v346_v44 = vld [vmem:[#allocation5 + $0x258] sm:$0xff]  ;;  %v1411_v46 = vpack.c.bf16 %v339_v38, %v335_v37 }
  0x6e   : > { %1400 = vmatpush1.bf16.msra.mxu0 %v1399_v10  ;;  %v348_v43 = vld [vmem:[#allocation5 + $0x268] sm:$0xff]  ;;  %v350_v45 = vld [vmem:[#allocation5 + $0x278] sm:$0xff]  ;;  %v1539_v47 = vpack.c.bf16 %v341_v41, %v337_v39  ;;  %v343_v49 = vld [vmem:[#allocation5 + $0x240] sm:$0xff] }
  0x6f   : > { %1528 = vmatpush1.bf16.msra.mxu1 %v1527_v11  ;;  %1402 = vmatprep.subr.bf16.mxu0 %v1401_v12  ;;  %v1413_v48 = vpack.c.bf16 %v348_v43, %v344_v42  ;;  %v347_v50 = vld [vmem:[#allocation5 + $0x260] sm:$0xff]  ;;  %v345_v51 = vld [vmem:[#allocation5 + $0x250] sm:$0xff]  ;;  %v1541_v52 = vpack.c.bf16 %v350_v45, %v346_v44  ;;  %v352_v54 = vld [vmem:[#allocation5 + $0x288] sm:$0xff] }
  0x70   : > { %1530 = vmatprep.subr.bf16.mxu1 %v1529_v16  ;;  %v349_v53 = vld [vmem:[#allocation5 + $0x270] sm:$0xff]  ;;  %v356_v55 = vld [vmem:[#allocation5 + $0x2a8] sm:$0xff]  ;;  %v354_v56 = vld [vmem:[#allocation5 + $0x298] sm:$0xff]  ;;  %v1415_v58 = vpack.c.bf16 %v347_v50, %v343_v49 }
  0x71   : > { %v358_v57 = vld [vmem:[#allocation5 + $0x2b8] sm:$0xff]  ;;  %v1543_v59 = vpack.c.bf16 %v349_v53, %v345_v51  ;;  %v1417_v60 = vpack.c.bf16 %v356_v55, %v352_v54  ;;  %v351_v61 = vld [vmem:[#allocation5 + $0x280] sm:$0xff]  ;;  %v353_v63 = vld [vmem:[#allocation5 + $0x290] sm:$0xff] }
  0x72   : > { %1404 = vmatpush1.bf16.msra.mxu0 %v1403_v22  ;;  %v355_v62 = vld [vmem:[#allocation5 + $0x2a0] sm:$0xff]  ;;  %v1545_v0 = vpack.c.bf16 %v358_v57, %v354_v56  ;;  %v357_v1 = vld [vmem:[#allocation5 + $0x2b0] sm:$0xff]  ;;  %v360_v2 = vld [vmem:[#allocation5 + $0x2c8] sm:$0xff] }
  0x73   : > { %1532 = vmatpush1.bf16.msra.mxu1 %v1531_v23  ;;  %1406 = vmatprep.subr.bf16.mxu0 %v1405_v24  ;;  %v364_v3 = vld [vmem:[#allocation5 + $0x2e8] sm:$0xff]  ;;  %v362_v4 = vld [vmem:[#allocation5 + $0x2d8] sm:$0xff]  ;;  %v1419_v6 = vpack.c.bf16 %v355_v62, %v351_v61  ;;  %v359_v7 = vld [vmem:[#allocation5 + $0x2c0] sm:$0xff]  ;;  %v1547_v8 = vpack.c.bf16 %v357_v1, %v353_v63 }
  0x74   : > { %1534 = vmatprep.subr.bf16.mxu1 %v1533_v28  ;;  %v366_v5 = vld [vmem:[#allocation5 + $0x2f8] sm:$0xff]  ;;  %v1421_v9 = vpack.c.bf16 %v364_v3, %v360_v2  ;;  %v363_v10 = vld [vmem:[#allocation5 + $0x2e0] sm:$0xff]  ;;  %v361_v11 = vld [vmem:[#allocation5 + $0x2d0] sm:$0xff] }
  0x75   : > { %v365_v12 = vld [vmem:[#allocation5 + $0x2f0] sm:$0xff]  ;;  %v1549_v13 = vpack.c.bf16 %v366_v5, %v362_v4  ;;  %v368_v14 = vld [vmem:[#allocation5 + $0x308] sm:$0xff]  ;;  %v370_v17 = vld [vmem:[#allocation5 + $0x318] sm:$0xff]  ;;  %v1423_v19 = vpack.c.bf16 %v363_v10, %v359_v7 }
  0x76   : > { %1408 = vmatpush1.bf16.msra.mxu0 %v1407_v34  ;;  %v372_v15 = vld [vmem:[#allocation5 + $0x328] sm:$0xff]  ;;  %v374_v18 = vld [vmem:[#allocation5 + $0x338] sm:$0xff]  ;;  %v1551_v20 = vpack.c.bf16 %v365_v12, %v361_v11  ;;  %v367_v22 = vld [vmem:[#allocation5 + $0x300] sm:$0xff] }
  0x77   : > { %1536 = vmatpush1.bf16.msra.mxu1 %v1535_v35  ;;  %1410 = vmatprep.subr.bf16.mxu0 %v1409_v36  ;;  %v208_v16 = vld [vmem:[%s2130_s26 + $0x8] sm:$0xff]  ;;  %v1425_v21 = vpack.c.bf16 %v372_v15, %v368_v14  ;;  %v371_v23 = vld [vmem:[#allocation5 + $0x320] sm:$0xff]  ;;  %v369_v24 = vld [vmem:[#allocation5 + $0x310] sm:$0xff]  ;;  %v1553_v25 = vpack.c.bf16 %v374_v18, %v370_v17 }
  0x78   : > { %1538 = vmatprep.subr.bf16.mxu1 %v1537_v40  ;;  %613 = vmatprep.mubr.f32.mxu0 %v208_v16  ;;  %v373_v26 = vld [vmem:[#allocation5 + $0x330] sm:$0xff]  ;;  %v376_v27 = vld [vmem:[#allocation5 + $0x348] sm:$0xff]  ;;  %v378_v29 = vld [vmem:[#allocation5 + $0x358] sm:$0xff]  ;;  %v1427_v31 = vpack.c.bf16 %v371_v23, %v367_v22 }
  0x79   : > { %935 = vmatprep.mubr.f32.mxu1 %v208_v16  ;;  %v380_v28 = vld [vmem:[#allocation5 + $0x368] sm:$0xff]  ;;  %v382_v30 = vld [vmem:[#allocation5 + $0x378] sm:$0xff]  ;;  %v1555_v32 = vpack.c.bf16 %v373_v26, %v369_v24  ;;  %v375_v34 = vld [vmem:[#allocation5 + $0x340] sm:$0xff] }
  0x7a   : > { %1412 = vmatpush1.bf16.msra.mxu0 %v1411_v46  ;;  %v1429_v33 = vpack.c.bf16 %v380_v28, %v376_v27  ;;  %v379_v35 = vld [vmem:[#allocation5 + $0x360] sm:$0xff]  ;;  %v377_v36 = vld [vmem:[#allocation5 + $0x350] sm:$0xff]  ;;  %v1557_v37 = vpack.c.bf16 %v382_v30, %v378_v29  ;;  %v384_v39 = vld [vmem:[#allocation5 + $0x388] sm:$0xff] }
  0x7b   : > { %1540 = vmatpush1.bf16.msra.mxu1 %v1539_v47  ;;  %1414 = vmatprep.subr.bf16.mxu0 %v1413_v48  ;;  %v381_v38 = vld [vmem:[#allocation5 + $0x370] sm:$0xff]  ;;  %v388_v40 = vld [vmem:[#allocation5 + $0x3a8] sm:$0xff]  ;;  %v386_v41 = vld [vmem:[#allocation5 + $0x398] sm:$0xff]  ;;  %v1431_v43 = vpack.c.bf16 %v379_v35, %v375_v34 }
  0x7c   : > { %1542 = vmatprep.subr.bf16.mxu1 %v1541_v52  ;;  %v390_v42 = vld [vmem:[#allocation5 + $0x3b8] sm:$0xff]  ;;  %v1559_v44 = vpack.c.bf16 %v381_v38, %v377_v36  ;;  %v1433_v45 = vpack.c.bf16 %v388_v40, %v384_v39  ;;  %v383_v46 = vld [vmem:[#allocation5 + $0x380] sm:$0xff]  ;;  %v385_v48 = vld [vmem:[#allocation5 + $0x390] sm:$0xff] }
  0x7d   : > { %v387_v47 = vld [vmem:[#allocation5 + $0x3a0] sm:$0xff]  ;;  %v1561_v49 = vpack.c.bf16 %v390_v42, %v386_v41  ;;  %v389_v50 = vld [vmem:[#allocation5 + $0x3b0] sm:$0xff]  ;;  %v392_v51 = vld [vmem:[#allocation5 + $0x3c8] sm:$0xff] }
  0x7e   : > { %1416 = vmatpush1.bf16.msra.mxu0 %v1415_v58  ;;  %v396_v52 = vld [vmem:[#allocation5 + $0x3e8] sm:$0xff]  ;;  %v394_v53 = vld [vmem:[#allocation5 + $0x3d8] sm:$0xff]  ;;  %v1435_v55 = vpack.c.bf16 %v387_v47, %v383_v46  ;;  %v1563_v56 = vpack.c.bf16 %v389_v50, %v385_v48  ;;  %v391_v58 = vld [vmem:[#allocation5 + $0x3c0] sm:$0xff] }
  0x7f   : > { %1544 = vmatpush1.bf16.msra.mxu1 %v1543_v59  ;;  %1418 = vmatprep.subr.bf16.mxu0 %v1417_v60  ;;  %v398_v54 = vld [vmem:[#allocation5 + $0x3f8] sm:$0xff]  ;;  %v1437_v57 = vpack.c.bf16 %v396_v52, %v392_v51  ;;  %v395_v59 = vld [vmem:[#allocation5 + $0x3e0] sm:$0xff]  ;;  %v393_v60 = vld [vmem:[#allocation5 + $0x3d0] sm:$0xff] }
  0x80   : > { %1546 = vmatprep.subr.bf16.mxu1 %v1545_v0  ;;  %v1565_v61 = vpack.c.bf16 %v398_v54, %v394_v53  ;;  %v397_v62 = vld [vmem:[#allocation5 + $0x3f0] sm:$0xff]  ;;  %v400_v63 = vld [vmem:[#allocation5 + $0x408] sm:$0xff]  ;;  %v402_v1 = vld [vmem:[#allocation5 + $0x418] sm:$0xff]  ;;  %v1439_v3 = vpack.c.bf16 %v395_v59, %v391_v58 }
  0x81   : > { %v404_v0 = vld [vmem:[#allocation5 + $0x428] sm:$0xff]  ;;  %v406_v2 = vld [vmem:[#allocation5 + $0x438] sm:$0xff]  ;;  %v1567_v4 = vpack.c.bf16 %v397_v62, %v393_v60  ;;  %v403_v7 = vld [vmem:[#allocation5 + $0x420] sm:$0xff] }
  0x82   : > { %1420 = vmatpush1.bf16.msra.mxu0 %v1419_v6  ;;  %v1441_v5 = vpack.c.bf16 %v404_v0, %v400_v63  ;;  %v399_v6 = vld [vmem:[#allocation5 + $0x400] sm:$0xff]  ;;  %v405_v10 = vld [vmem:[#allocation5 + $0x430] sm:$0xff]  ;;  %v408_v11 = vld [vmem:[#allocation5 + $0x448] sm:$0xff] }
  0x83   : > { %1548 = vmatpush1.bf16.msra.mxu1 %v1547_v8  ;;  %1422 = vmatprep.subr.bf16.mxu0 %v1421_v9  ;;  %v1569_v8 = vpack.c.bf16 %v406_v2, %v402_v1  ;;  %v401_v9 = vld [vmem:[#allocation5 + $0x410] sm:$0xff]  ;;  %v412_v12 = vld [vmem:[#allocation5 + $0x468] sm:$0xff]  ;;  %v1443_v14 = vpack.c.bf16 %v403_v7, %v399_v6  ;;  %v410_v15 = vld [vmem:[#allocation5 + $0x458] sm:$0xff] }
  0x84   : > { %1550 = vmatprep.subr.bf16.mxu1 %v1549_v13  ;;  %v207_v13 = vld [vmem:[%s2130_s26] sm:$0xff]  ;;  %v414_v16 = vld [vmem:[#allocation5 + $0x478] sm:$0xff]  ;;  %v1571_v17 = vpack.c.bf16 %v405_v10, %v401_v9  ;;  %v409_v22 = vld [vmem:[#allocation5 + $0x450] sm:$0xff] }
  0x85   : > { %v407_v18 = vld [vmem:[#allocation5 + $0x440] sm:$0xff]  ;;  %v413_v23 = vld [vmem:[#allocation5 + $0x470] sm:$0xff]  ;;  %v1573_v24 = vpack.c.bf16 %v414_v16, %v410_v15  ;;  %v420_v26 = vld [vmem:[#allocation5 + $0x4a8] sm:$0xff] }
  0x86   : > { %1424 = vmatpush1.bf16.msra.mxu0 %v1423_v19  ;;  %v411_v19 = vld [vmem:[#allocation5 + $0x460] sm:$0xff]  ;;  %v418_v29 = vld [vmem:[#allocation5 + $0x498] sm:$0xff]  ;;  %v216_v34 = vld [vmem:[%s2130_s26 + $0x48] sm:$0xff] }
  0x87   : > { %1552 = vmatpush1.bf16.msra.mxu1 %v1551_v20  ;;  %1426 = vmatprep.subr.bf16.mxu0 %v1425_v21  ;;  %v212_v20 = vld [vmem:[%s2130_s26 + $0x28] sm:$0xff]  ;;  %v1445_v21 = vpack.c.bf16 %v412_v12, %v408_v11  ;;  %v211_v27 = vld [vmem:[%s2130_s26 + $0x20] sm:$0xff]  ;;  %v1447_v28 = vpack.c.bf16 %v411_v19, %v407_v18  ;;  %v422_v30 = vld [vmem:[#allocation5 + $0x4b8] sm:$0xff] }
  0x88   : > { %1554 = vmatprep.subr.bf16.mxu1 %v1553_v25  ;;  %v416_v25 = vld [vmem:[#allocation5 + $0x488] sm:$0xff]  ;;  %v417_v36 = vld [vmem:[#allocation5 + $0x490] sm:$0xff]  ;;  %v1577_v38 = vpack.c.bf16 %v422_v30, %v418_v29  ;;  %v215_v41 = vld [vmem:[%s2130_s26 + $0x40] sm:$0xff] }
  0x89   : > { %v1449_v35 = vpack.c.bf16 %v420_v26, %v416_v25  ;;  %v424_v39 = vld [vmem:[#allocation5 + $0x4c8] sm:$0xff]  ;;  %v423_v46 = vld [vmem:[#allocation5 + $0x4c0] sm:$0xff]  ;;  %v425_v50 = vld [vmem:[#allocation5 + $0x4d0] sm:$0xff] }
  0x8a   : > { %1428 = vmatpush1.bf16.msra.mxu0 %v1427_v31  ;;  %v1575_v31 = vpack.c.bf16 %v413_v23, %v409_v22  ;;  %v428_v40 = vld [vmem:[#allocation5 + $0x4e8] sm:$0xff]  ;;  %v427_v47 = vld [vmem:[#allocation5 + $0x4e0] sm:$0xff]  ;;  %v429_v51 = vld [vmem:[#allocation5 + $0x4f0] sm:$0xff] }
  0x8b   : > { %1556 = vmatpush1.bf16.msra.mxu1 %v1555_v32  ;;  %1430 = vmatprep.subr.bf16.mxu0 %v1429_v33  ;;  %v415_v32 = vld [vmem:[#allocation5 + $0x480] sm:$0xff]  ;;  %v220_v48 = vld [vmem:[%s2130_s26 + $0x68] sm:$0xff]  ;;  %v438_v58 = vld [vmem:[#allocation5 + $0x538] sm:$0xff]  ;;  %v1583_v59 = vpack.c.bf16 %v429_v51, %v425_v50 }
  0x8c   : > { %1558 = vmatprep.subr.bf16.mxu1 %v1557_v37  ;;  %v419_v33 = vld [vmem:[#allocation5 + $0x4a0] sm:$0xff]  ;;  %v421_v37 = vld [vmem:[#allocation5 + $0x4b0] sm:$0xff]  ;;  %v432_v53 = vld [vmem:[#allocation5 + $0x508] sm:$0xff] }
  0x8d   : > { %v1451_v42 = vpack.c.bf16 %v419_v33, %v415_v32  ;;  %v436_v54 = vld [vmem:[#allocation5 + $0x528] sm:$0xff]  ;;  %v431_v60 = vld [vmem:[#allocation5 + $0x500] sm:$0xff]  ;;  %v433_v0 = vld [vmem:[#allocation5 + $0x510] sm:$0xff] }
  0x8e   : > { %1432 = vmatpush1.bf16.msra.mxu0 %v1431_v43  ;;  %v426_v43 = vld [vmem:[#allocation5 + $0x4d8] sm:$0xff]  ;;  %v224_v62 = vld [vmem:[%s2130_s26 + $0x88] sm:$0xff]  ;;  %v1457_v63 = vpack.c.bf16 %v436_v54, %v432_v53  ;;  %v437_v1 = vld [vmem:[#allocation5 + $0x530] sm:$0xff] }
  0x8f   : > { %1560 = vmatpush1.bf16.msra.mxu1 %v1559_v44  ;;  %1434 = vmatprep.subr.bf16.mxu0 %v1433_v45  ;;  %v430_v44 = vld [vmem:[#allocation5 + $0x4f8] sm:$0xff]  ;;  %v1579_v45 = vpack.c.bf16 %v421_v37, %v417_v36  ;;  %v1587_v9 = vpack.c.bf16 %v437_v1, %v433_v0  ;;  %v439_v10 = vld [vmem:[#allocation5 + $0x540] sm:$0xff]  ;;  %v228_v12 = vld [vmem:[%s2130_s26 + $0xa8] sm:$0xff] }
  0x90   : > { %1562 = vmatprep.subr.bf16.mxu1 %v1561_v49  ;;  %v1453_v49 = vpack.c.bf16 %v428_v40, %v424_v39  ;;  %v1581_v52 = vpack.c.bf16 %v430_v44, %v426_v43  ;;  %v442_v7 = vld [vmem:[#allocation5 + $0x558] sm:$0xff]  ;;  %v443_v11 = vld [vmem:[#allocation5 + $0x560] sm:$0xff]  ;;  %v445_v15 = vld [vmem:[#allocation5 + $0x570] sm:$0xff] }
  0x91   : > { %v452_v18 = vld [vmem:[#allocation5 + $0x5a8] sm:$0xff]  ;;  %v227_v19 = vld [vmem:[%s2130_s26 + $0xa0] sm:$0xff]  ;;  %v454_v22 = vld [vmem:[#allocation5 + $0x5b8] sm:$0xff] }
  0x92   : > { %1436 = vmatpush1.bf16.msra.mxu0 %v1435_v55  ;;  %v219_v55 = vld [vmem:[%s2130_s26 + $0x60] sm:$0xff]  ;;  %v232_v26 = vld [vmem:[%s2130_s26 + $0xc8] sm:$0xff]  ;;  %v453_v29 = vld [vmem:[#allocation5 + $0x5b0] sm:$0xff] }
  0x93   : > { %1564 = vmatpush1.bf16.msra.mxu1 %v1563_v56  ;;  %1438 = vmatprep.subr.bf16.mxu0 %v1437_v57  ;;  %v1455_v56 = vpack.c.bf16 %v427_v47, %v423_v46  ;;  %v434_v57 = vld [vmem:[#allocation5 + $0x518] sm:$0xff]  ;;  %v451_v25 = vld [vmem:[#allocation5 + $0x5a0] sm:$0xff]  ;;  %v460_v32 = vld [vmem:[#allocation5 + $0x5e8] sm:$0xff] }
  0x94   : > { %1566 = vmatprep.subr.bf16.mxu1 %v1565_v61  ;;  %v435_v61 = vld [vmem:[#allocation5 + $0x520] sm:$0xff]  ;;  %v1585_v2 = vpack.c.bf16 %v438_v58, %v434_v57  ;;  %v462_v36 = vld [vmem:[#allocation5 + $0x5f8] sm:$0xff]  ;;  %v236_v40 = vld [vmem:[%s2130_s26 + $0xe8] sm:$0xff] }
  0x95   : > { %v1459_v6 = vpack.c.bf16 %v435_v61, %v431_v60  ;;  %v231_v33 = vld [vmem:[%s2130_s26 + $0xc0] sm:$0xff]  ;;  %v461_v43 = vld [vmem:[#allocation5 + $0x5f0] sm:$0xff]  ;;  %v468_v46 = vld [vmem:[#allocation5 + $0x628] sm:$0xff] }
  0x96   : > { %1440 = vmatpush1.bf16.msra.mxu0 %v1439_v3  ;;  %v440_v3 = vld [vmem:[#allocation5 + $0x548] sm:$0xff]  ;;  %v459_v39 = vld [vmem:[#allocation5 + $0x5e0] sm:$0xff]  ;;  %v470_v50 = vld [vmem:[#allocation5 + $0x638] sm:$0xff] }
  0x97   : > { %1568 = vmatpush1.bf16.msra.mxu1 %v1567_v4  ;;  %1442 = vmatprep.subr.bf16.mxu0 %v1441_v5  ;;  %v444_v4 = vld [vmem:[#allocation5 + $0x568] sm:$0xff]  ;;  %v223_v5 = vld [vmem:[%s2130_s26 + $0x80] sm:$0xff]  ;;  %v469_v57 = vld [vmem:[#allocation5 + $0x630] sm:$0xff] }
  0x98   : > { %1570 = vmatprep.subr.bf16.mxu1 %v1569_v8  ;;  %v446_v8 = vld [vmem:[#allocation5 + $0x578] sm:$0xff]  ;;  %v235_v47 = vld [vmem:[%s2130_s26 + $0xe0] sm:$0xff]  ;;  %v240_v54 = vld [vmem:[%s2130_s26 + $0x108] sm:$0xff] }
  0x99   : > { %614 = vmatmul.mubr.f32.vlgmr.msra.gmra.mrb[0].mxu0 %v207_v13  ;;  %v1589_v16 = vpack.c.bf16 %v446_v8, %v442_v7  ;;  %v467_v53 = vld [vmem:[#allocation5 + $0x620] sm:$0xff]  ;;  %v476_v60 = vld [vmem:[#allocation5 + $0x668] sm:$0xff]  ;;  %v478_v0 = vld [vmem:[#allocation5 + $0x678] sm:$0xff] }
  0x9a   : > { %936 = vmatmul.mubr.f32.vlgmr.msra.gmra.mrb[0].mxu1 %v207_v13  ;;  %1444 = vmatpush1.bf16.msra.mxu0 %v1443_v14  ;;  %v1461_v13 = vpack.c.bf16 %v444_v4, %v440_v3  ;;  %v441_v14 = vld [vmem:[#allocation5 + $0x550] sm:$0xff]  ;;  %v239_v61 = vld [vmem:[%s2130_s26 + $0x100] sm:$0xff]  ;;  %v244_v4 = vld [vmem:[%s2130_s26 + $0x128] sm:$0xff] }
  0x9b   : > { %1572 = vmatpush1.bf16.msra.mxu1 %v1571_v17  ;;  %619 = vmatprep.mubr.f32.mxu0 %v212_v20  ;;  %v448_v17 = vld [vmem:[#allocation5 + $0x588] sm:$0xff]  ;;  %v1591_v23 = vpack.c.bf16 %v445_v15, %v441_v14  ;;  %v475_v3 = vld [vmem:[#allocation5 + $0x660] sm:$0xff]  ;;  %v477_v7 = vld [vmem:[#allocation5 + $0x670] sm:$0xff] }
  0x9c   : > { %941 = vmatprep.mubr.f32.mxu1 %v212_v20  ;;  %1446 = vmatprep.subr.bf16.mxu0 %v1445_v21  ;;  %v1463_v20 = vpack.c.bf16 %v443_v11, %v439_v10  ;;  %v450_v21 = vld [vmem:[#allocation5 + $0x598] sm:$0xff]  ;;  %v484_v10 = vld [vmem:[#allocation5 + $0x6a8] sm:$0xff]  ;;  %v243_v11 = vld [vmem:[%s2130_s26 + $0x120] sm:$0xff] }
  0x9d   : > { %620 = vmatmul.mubr.f32.gmra.mrb[2].mxu0 %v211_v27  ;;  %1574 = vmatprep.subr.bf16.mxu1 %v1573_v24  ;;  %v447_v24 = vld [vmem:[#allocation5 + $0x580] sm:$0xff]  ;;  %v1593_v30 = vpack.c.bf16 %v454_v22, %v450_v21  ;;  %v486_v14 = vld [vmem:[#allocation5 + $0x6b8] sm:$0xff]  ;;  %v485_v21 = vld [vmem:[#allocation5 + $0x6b0] sm:$0xff] }
  0x9e   : > { %942 = vmatmul.mubr.f32.gmra.mrb[2].mxu1 %v211_v27  ;;  %1448 = vmatpush1.bf16.msra.mxu0 %v1447_v28  ;;  %v1465_v27 = vpack.c.bf16 %v452_v18, %v448_v17  ;;  %v449_v28 = vld [vmem:[#allocation5 + $0x590] sm:$0xff]  ;;  %v483_v17 = vld [vmem:[#allocation5 + $0x6a0] sm:$0xff]  ;;  %v248_v18 = vld [vmem:[%s2130_s26 + $0x148] sm:$0xff] }
  0x9f   : > { %1576 = vmatpush1.bf16.msra.mxu1 %v1575_v31  ;;  %625 = vmatprep.mubr.f32.mxu0 %v216_v34  ;;  %v456_v31 = vld [vmem:[#allocation5 + $0x5c8] sm:$0xff]  ;;  %v1595_v37 = vpack.c.bf16 %v453_v29, %v449_v28  ;;  %v494_v28 = vld [vmem:[#allocation5 + $0x6f8] sm:$0xff] }
  0xa0   : > { %947 = vmatprep.mubr.f32.mxu1 %v216_v34  ;;  %1450 = vmatprep.subr.bf16.mxu0 %v1449_v35  ;;  %v1467_v34 = vpack.c.bf16 %v451_v25, %v447_v24  ;;  %v458_v35 = vld [vmem:[#allocation5 + $0x5d8] sm:$0xff]  ;;  %v492_v24 = vld [vmem:[#allocation5 + $0x6e8] sm:$0xff]  ;;  %v247_v25 = vld [vmem:[%s2130_s26 + $0x140] sm:$0xff] }
  0xa1   : > { %626 = vmatmul.mubr.f32.gmra.mrb[4].mxu0 %v215_v41  ;;  %1578 = vmatprep.subr.bf16.mxu1 %v1577_v38  ;;  %v455_v38 = vld [vmem:[#allocation5 + $0x5c0] sm:$0xff]  ;;  %v1597_v44 = vpack.c.bf16 %v462_v36, %v458_v35  ;;  %v493_v35 = vld [vmem:[#allocation5 + $0x6f0] sm:$0xff] }
  0xa2   : > { %948 = vmatmul.mubr.f32.gmra.mrb[4].mxu1 %v215_v41  ;;  %1452 = vmatpush1.bf16.msra.mxu0 %v1451_v42  ;;  %v1469_v41 = vpack.c.bf16 %v460_v32, %v456_v31  ;;  %v457_v42 = vld [vmem:[#allocation5 + $0x5d0] sm:$0xff]  ;;  %v491_v31 = vld [vmem:[#allocation5 + $0x6e0] sm:$0xff]  ;;  %v252_v32 = vld [vmem:[%s2130_s26 + $0x168] sm:$0xff] }
  0xa3   : > { %1580 = vmatpush1.bf16.msra.mxu1 %v1579_v45  ;;  %631 = vmatprep.mubr.f32.mxu0 %v220_v48  ;;  %v464_v45 = vld [vmem:[#allocation5 + $0x608] sm:$0xff]  ;;  %v1599_v51 = vpack.c.bf16 %v461_v43, %v457_v42  ;;  %v502_v42 = vld [vmem:[#allocation5 + $0x738] sm:$0xff] }
  0xa4   : > { %953 = vmatprep.mubr.f32.mxu1 %v220_v48  ;;  %1454 = vmatprep.subr.bf16.mxu0 %v1453_v49  ;;  %v1471_v48 = vpack.c.bf16 %v459_v39, %v455_v38  ;;  %v466_v49 = vld [vmem:[#allocation5 + $0x618] sm:$0xff]  ;;  %v500_v38 = vld [vmem:[#allocation5 + $0x728] sm:$0xff]  ;;  %v251_v39 = vld [vmem:[%s2130_s26 + $0x160] sm:$0xff] }
  0xa5   : > { %632 = vmatmul.mubr.f32.gmra.mrb[6].mxu0 %v219_v55  ;;  %1582 = vmatprep.subr.bf16.mxu1 %v1581_v52  ;;  %v463_v52 = vld [vmem:[#allocation5 + $0x600] sm:$0xff]  ;;  %v1601_v58 = vpack.c.bf16 %v470_v50, %v466_v49  ;;  %v501_v49 = vld [vmem:[#allocation5 + $0x730] sm:$0xff] }
  0xa6   : > { %954 = vmatmul.mubr.f32.gmra.mrb[6].mxu1 %v219_v55  ;;  %1456 = vmatpush1.bf16.msra.mxu0 %v1455_v56  ;;  %v1473_v55 = vpack.c.bf16 %v468_v46, %v464_v45  ;;  %v465_v56 = vld [vmem:[#allocation5 + $0x610] sm:$0xff]  ;;  %v499_v45 = vld [vmem:[#allocation5 + $0x720] sm:$0xff]  ;;  %v256_v46 = vld [vmem:[%s2130_s26 + $0x188] sm:$0xff] }
  0xa7   : > { %1584 = vmatpush1.bf16.msra.mxu1 %v1583_v59  ;;  %637 = vmatprep.mubr.f32.mxu0 %v224_v62  ;;  %v472_v59 = vld [vmem:[#allocation5 + $0x648] sm:$0xff]  ;;  %v1603_v1 = vpack.c.bf16 %v469_v57, %v465_v56  ;;  %v510_v56 = vld [vmem:[#allocation5 + $0x778] sm:$0xff] }
  0xa8   : > { %959 = vmatprep.mubr.f32.mxu1 %v224_v62  ;;  %1458 = vmatprep.subr.bf16.mxu0 %v1457_v63  ;;  %v1475_v62 = vpack.c.bf16 %v467_v53, %v463_v52  ;;  %v474_v63 = vld [vmem:[#allocation5 + $0x658] sm:$0xff]  ;;  %v508_v52 = vld [vmem:[#allocation5 + $0x768] sm:$0xff]  ;;  %v255_v53 = vld [vmem:[%s2130_s26 + $0x180] sm:$0xff] }
  0xa9   : > { %638 = vmatmul.mubr.f32.gmra.mrb[8].mxu0 %v223_v5  ;;  %1586 = vmatprep.subr.bf16.mxu1 %v1585_v2  ;;  %v471_v2 = vld [vmem:[#allocation5 + $0x640] sm:$0xff]  ;;  %v1605_v8 = vpack.c.bf16 %v478_v0, %v474_v63  ;;  %v509_v63 = vld [vmem:[#allocation5 + $0x770] sm:$0xff] }
  0xaa   : > { %960 = vmatmul.mubr.f32.gmra.mrb[8].mxu1 %v223_v5  ;;  %1460 = vmatpush1.bf16.msra.mxu0 %v1459_v6  ;;  %v1477_v5 = vpack.c.bf16 %v476_v60, %v472_v59  ;;  %v473_v6 = vld [vmem:[#allocation5 + $0x650] sm:$0xff]  ;;  %v507_v59 = vld [vmem:[#allocation5 + $0x760] sm:$0xff]  ;;  %v260_v60 = vld [vmem:[%s2130_s26 + $0x1a8] sm:$0xff] }
  0xab   : > { %1588 = vmatpush1.bf16.msra.mxu1 %v1587_v9  ;;  %643 = vmatprep.mubr.f32.mxu0 %v228_v12  ;;  %v480_v9 = vld [vmem:[#allocation5 + $0x688] sm:$0xff]  ;;  %v1607_v15 = vpack.c.bf16 %v477_v7, %v473_v6  ;;  %v518_v6 = vld [vmem:[#allocation5 + $0x7b8] sm:$0xff] }
  0xac   : > { %965 = vmatprep.mubr.f32.mxu1 %v228_v12  ;;  %1462 = vmatprep.subr.bf16.mxu0 %v1461_v13  ;;  %v1479_v12 = vpack.c.bf16 %v475_v3, %v471_v2  ;;  %v482_v13 = vld [vmem:[#allocation5 + $0x698] sm:$0xff]  ;;  %v516_v2 = vld [vmem:[#allocation5 + $0x7a8] sm:$0xff]  ;;  %v259_v3 = vld [vmem:[%s2130_s26 + $0x1a0] sm:$0xff] }
  0xad   : > { %644 = vmatmul.mubr.f32.gmra.mrb[10].mxu0 %v227_v19  ;;  %1590 = vmatprep.subr.bf16.mxu1 %v1589_v16  ;;  %v479_v16 = vld [vmem:[#allocation5 + $0x680] sm:$0xff]  ;;  %v1609_v22 = vpack.c.bf16 %v486_v14, %v482_v13  ;;  %v517_v13 = vld [vmem:[#allocation5 + $0x7b0] sm:$0xff] }
  0xae   : > { %966 = vmatmul.mubr.f32.gmra.mrb[10].mxu1 %v227_v19  ;;  %1464 = vmatpush1.bf16.msra.mxu0 %v1463_v20  ;;  %v1481_v19 = vpack.c.bf16 %v484_v10, %v480_v9  ;;  %v481_v20 = vld [vmem:[#allocation5 + $0x690] sm:$0xff]  ;;  %v515_v9 = vld [vmem:[#allocation5 + $0x7a0] sm:$0xff]  ;;  %v264_v10 = vld [vmem:[%s2130_s26 + $0x1c8] sm:$0xff] }
  0xaf   : > { %1592 = vmatpush1.bf16.msra.mxu1 %v1591_v23  ;;  %649 = vmatprep.mubr.f32.mxu0 %v232_v26  ;;  %v488_v23 = vld [vmem:[#allocation5 + $0x6c8] sm:$0xff]  ;;  %v1611_v29 = vpack.c.bf16 %v485_v21, %v481_v20  ;;  %v526_v20 = vld [vmem:[#allocation5 + $0x7f8] sm:$0xff] }
  0xb0   : > { %971 = vmatprep.mubr.f32.mxu1 %v232_v26  ;;  %1466 = vmatprep.subr.bf16.mxu0 %v1465_v27  ;;  %v1483_v26 = vpack.c.bf16 %v483_v17, %v479_v16  ;;  %v490_v27 = vld [vmem:[#allocation5 + $0x6d8] sm:$0xff]  ;;  %v524_v16 = vld [vmem:[#allocation5 + $0x7e8] sm:$0xff]  ;;  %v263_v17 = vld [vmem:[%s2130_s26 + $0x1c0] sm:$0xff] }
  0xb1   : > { %650 = vmatmul.mubr.f32.gmra.mrb[12].mxu0 %v231_v33  ;;  %1594 = vmatprep.subr.bf16.mxu1 %v1593_v30  ;;  %v487_v30 = vld [vmem:[#allocation5 + $0x6c0] sm:$0xff]  ;;  %v1613_v36 = vpack.c.bf16 %v494_v28, %v490_v27  ;;  %v525_v27 = vld [vmem:[#allocation5 + $0x7f0] sm:$0xff] }
  0xb2   : > { %972 = vmatmul.mubr.f32.gmra.mrb[12].mxu1 %v231_v33  ;;  %1468 = vmatpush1.bf16.msra.mxu0 %v1467_v34  ;;  %v1485_v33 = vpack.c.bf16 %v492_v24, %v488_v23  ;;  %v489_v34 = vld [vmem:[#allocation5 + $0x6d0] sm:$0xff]  ;;  %v523_v23 = vld [vmem:[#allocation5 + $0x7e0] sm:$0xff]  ;;  %v268_v24 = vld [vmem:[%s2130_s26 + $0x1e8] sm:$0xff] }
  0xb3   : > { %1596 = vmatpush1.bf16.msra.mxu1 %v1595_v37  ;;  %655 = vmatprep.mubr.f32.mxu0 %v236_v40  ;;  %v496_v37 = vld [vmem:[#allocation5 + $0x708] sm:$0xff]  ;;  %v1615_v43 = vpack.c.bf16 %v493_v35, %v489_v34  ;;  %v214_v34 = vld [vmem:[%s2130_s26 + $0x38] sm:$0xff]  ;;  %v213_v35 = vld [vmem:[%s2130_s26 + $0x30] sm:$0xff] }
  0xb4   : > { %977 = vmatprep.mubr.f32.mxu1 %v236_v40  ;;  %1470 = vmatprep.subr.bf16.mxu0 %v1469_v41  ;;  %v1487_v40 = vpack.c.bf16 %v491_v31, %v487_v30  ;;  %v498_v41 = vld [vmem:[#allocation5 + $0x718] sm:$0xff] }
  0xb5   : > { %656 = vmatmul.mubr.f32.gmra.mrb[14].mxu0 %v235_v47  ;;  %1598 = vmatprep.subr.bf16.mxu1 %v1597_v44  ;;  %v495_v44 = vld [vmem:[#allocation5 + $0x700] sm:$0xff]  ;;  %v1617_v50 = vpack.c.bf16 %v502_v42, %v498_v41  ;;  %v225_v41 = vld [vmem:[%s2130_s26 + $0x90] sm:$0xff]  ;;  %v230_v42 = vld [vmem:[%s2130_s26 + $0xb8] sm:$0xff] }
  0xb6   : > { %978 = vmatmul.mubr.f32.gmra.mrb[14].mxu1 %v235_v47  ;;  %1472 = vmatpush1.bf16.msra.mxu0 %v1471_v48  ;;  %v1489_v47 = vpack.c.bf16 %v500_v38, %v496_v37  ;;  %v497_v48 = vld [vmem:[#allocation5 + $0x710] sm:$0xff]  ;;  %v222_v38 = vld [vmem:[%s2130_s26 + $0x78] sm:$0xff] }
  0xb7   : > { %1600 = vmatpush1.bf16.msra.mxu1 %v1599_v51  ;;  %661 = vmatprep.mubr.f32.mxu0 %v240_v54  ;;  %v504_v51 = vld [vmem:[#allocation5 + $0x748] sm:$0xff]  ;;  %v1619_v57 = vpack.c.bf16 %v501_v49, %v497_v48  ;;  %v217_v37 = vld [vmem:[%s2130_s26 + $0x50] sm:$0xff]  ;;  %v242_v48 = vld [vmem:[%s2130_s26 + $0x118] sm:$0xff] }
  0xb8   : > { %983 = vmatprep.mubr.f32.mxu1 %v240_v54  ;;  %1474 = vmatprep.subr.bf16.mxu0 %v1473_v55  ;;  %v1491_v54 = vpack.c.bf16 %v499_v45, %v495_v44  ;;  %v506_v55 = vld [vmem:[#allocation5 + $0x758] sm:$0xff]  ;;  %v233_v45 = vld [vmem:[%s2130_s26 + $0xd0] sm:$0xff] }
  0xb9   : > { %662 = vmatmul.mubr.f32.gmra.mrb[16].mxu0 %v239_v61  ;;  %1602 = vmatprep.subr.bf16.mxu1 %v1601_v58  ;;  %v503_v58 = vld [vmem:[#allocation5 + $0x740] sm:$0xff]  ;;  %v1621_v0 = vpack.c.bf16 %v510_v56, %v506_v55  ;;  %v234_v44 = vld [vmem:[%s2130_s26 + $0xd8] sm:$0xff]  ;;  %v241_v49 = vld [vmem:[%s2130_s26 + $0x110] sm:$0xff] }
  0xba   : > { %984 = vmatmul.mubr.f32.gmra.mrb[16].mxu1 %v239_v61  ;;  %1476 = vmatpush1.bf16.msra.mxu0 %v1475_v62  ;;  %v1493_v61 = vpack.c.bf16 %v508_v52, %v504_v51  ;;  %v505_v62 = vld [vmem:[#allocation5 + $0x750] sm:$0xff]  ;;  %v250_v52 = vld [vmem:[%s2130_s26 + $0x158] sm:$0xff] }
  0xbb   : > { %1604 = vmatpush1.bf16.msra.mxu1 %v1603_v1  ;;  %667 = vmatprep.mubr.f32.mxu0 %v244_v4  ;;  %v512_v1 = vld [vmem:[#allocation5 + $0x788] sm:$0xff]  ;;  %v1623_v7 = vpack.c.bf16 %v509_v63, %v505_v62  ;;  %v245_v51 = vld [vmem:[%s2130_s26 + $0x130] sm:$0xff]  ;;  %v258_v56 = vld [vmem:[%s2130_s26 + $0x198] sm:$0xff] }
  0xbc   : > { %989 = vmatprep.mubr.f32.mxu1 %v244_v4  ;;  %1478 = vmatprep.subr.bf16.mxu0 %v1477_v5  ;;  %v1495_v4 = vpack.c.bf16 %v507_v59, %v503_v58  ;;  %v514_v5 = vld [vmem:[#allocation5 + $0x798] sm:$0xff]  ;;  %v253_v55 = vld [vmem:[%s2130_s26 + $0x170] sm:$0xff] }
  0xbd   : > { %668 = vmatmul.mubr.f32.gmra.mrb[18].mxu0 %v243_v11  ;;  %1606 = vmatprep.subr.bf16.mxu1 %v1605_v8  ;;  %v511_v8 = vld [vmem:[#allocation5 + $0x780] sm:$0xff]  ;;  %v1625_v14 = vpack.c.bf16 %v518_v6, %v514_v5  ;;  %v262_v58 = vld [vmem:[%s2130_s26 + $0x1b8] sm:$0xff]  ;;  %v261_v59 = vld [vmem:[%s2130_s26 + $0x1b0] sm:$0xff] }
  0xbe   : > { %990 = vmatmul.mubr.f32.gmra.mrb[18].mxu1 %v243_v11  ;;  %1480 = vmatpush1.bf16.msra.mxu0 %v1479_v12  ;;  %v1497_v11 = vpack.c.bf16 %v516_v2, %v512_v1  ;;  %v513_v12 = vld [vmem:[#allocation5 + $0x790] sm:$0xff]  ;;  %v270_v62 = vld [vmem:[%s2130_s26 + $0x1f8] sm:$0xff] }
  0xbf   : > { %1608 = vmatpush1.bf16.msra.mxu1 %v1607_v15  ;;  %673 = vmatprep.mubr.f32.mxu0 %v248_v18  ;;  %v520_v15 = vld [vmem:[#allocation5 + $0x7c8] sm:$0xff]  ;;  %v1627_v21 = vpack.c.bf16 %v517_v13, %v513_v12  ;;  %v269_v63 = vld [vmem:[%s2130_s26 + $0x1f0] sm:$0xff] }
  0xc0   : > { %995 = vmatprep.mubr.f32.mxu1 %v248_v18  ;;  %1482 = vmatprep.subr.bf16.mxu0 %v1481_v19  ;;  %v1499_v18 = vpack.c.bf16 %v515_v9, %v511_v8  ;;  %v522_v19 = vld [vmem:[#allocation5 + $0x7d8] sm:$0xff] }
  0xc1   : > { %674 = vmatmul.mubr.f32.gmra.mrb[20].mxu0 %v247_v25  ;;  %1610 = vmatprep.subr.bf16.mxu1 %v1609_v22  ;;  %v519_v22 = vld [vmem:[#allocation5 + $0x7c0] sm:$0xff]  ;;  %v1629_v28 = vpack.c.bf16 %v526_v20, %v522_v19 }
  0xc2   : > { %996 = vmatmul.mubr.f32.gmra.mrb[20].mxu1 %v247_v25  ;;  %1484 = vmatpush1.bf16.msra.mxu0 %v1483_v26  ;;  %v1501_v25 = vpack.c.bf16 %v524_v16, %v520_v15  ;;  %v521_v26 = vld [vmem:[#allocation5 + $0x7d0] sm:$0xff]  ;;  %v1503_v30 = vpack.c.bf16 %v523_v23, %v519_v22 }
  0xc3   : > { %1612 = vmatpush1.bf16.msra.mxu1 %v1611_v29  ;;  %679 = vmatprep.mubr.f32.mxu0 %v252_v32  ;;  %v267_v29 = vld [vmem:[%s2130_s26 + $0x1e0] sm:$0xff]  ;;  %v1631_v31 = vpack.c.bf16 %v525_v27, %v521_v26 }
  0xc4   : > { %1001 = vmatprep.mubr.f32.mxu1 %v252_v32  ;;  %1486 = vmatprep.subr.bf16.mxu0 %v1485_v33  ;;  %v210_v32 = vld [vmem:[%s2130_s26 + $0x18] sm:$0xff]  ;;  %v209_v33 = vld [vmem:[%s2130_s26 + $0x10] sm:$0xff] }
  0xc5   : > { %680 = vmatmul.mubr.f32.gmra.mrb[22].mxu0 %v251_v39  ;;  %1614 = vmatprep.subr.bf16.mxu1 %v1613_v36  ;;  %v218_v36 = vld [vmem:[%s2130_s26 + $0x58] sm:$0xff] }
  0xc6   : > { %1002 = vmatmul.mubr.f32.gmra.mrb[22].mxu1 %v251_v39  ;;  %1488 = vmatpush1.bf16.msra.mxu0 %v1487_v40  ;;  %v221_v39 = vld [vmem:[%s2130_s26 + $0x70] sm:$0xff]  ;;  %v226_v40 = vld [vmem:[%s2130_s26 + $0x98] sm:$0xff] }
  0xc7   : > { %1616 = vmatpush1.bf16.msra.mxu1 %v1615_v43  ;;  %685 = vmatprep.mubr.f32.mxu0 %v256_v46  ;;  %v229_v43 = vld [vmem:[%s2130_s26 + $0xb0] sm:$0xff] }
  0xc8   : > { %1007 = vmatprep.mubr.f32.mxu1 %v256_v46  ;;  %1490 = vmatprep.subr.bf16.mxu0 %v1489_v47  ;;  %v238_v46 = vld [vmem:[%s2130_s26 + $0xf8] sm:$0xff]  ;;  %v237_v47 = vld [vmem:[%s2130_s26 + $0xf0] sm:$0xff] }
  0xc9   : > { %686 = vmatmul.mubr.f32.gmra.mrb[24].mxu0 %v255_v53  ;;  %1618 = vmatprep.subr.bf16.mxu1 %v1617_v50  ;;  %v246_v50 = vld [vmem:[%s2130_s26 + $0x138] sm:$0xff] }
  0xca   : > { %1008 = vmatmul.mubr.f32.gmra.mrb[24].mxu1 %v255_v53  ;;  %1492 = vmatpush1.bf16.msra.mxu0 %v1491_v54  ;;  %v249_v53 = vld [vmem:[%s2130_s26 + $0x150] sm:$0xff]  ;;  %v254_v54 = vld [vmem:[%s2130_s26 + $0x178] sm:$0xff] }
  0xcb   : > { %1620 = vmatpush1.bf16.msra.mxu1 %v1619_v57  ;;  %691 = vmatprep.mubr.f32.mxu0 %v260_v60  ;;  %v257_v57 = vld [vmem:[%s2130_s26 + $0x190] sm:$0xff] }
  0xcc   : > { %1013 = vmatprep.mubr.f32.mxu1 %v260_v60  ;;  %1494 = vmatprep.subr.bf16.mxu0 %v1493_v61  ;;  %v266_v60 = vld [vmem:[%s2130_s26 + $0x1d8] sm:$0xff]  ;;  %v265_v61 = vld [vmem:[%s2130_s26 + $0x1d0] sm:$0xff] }
  0xcd   : > { %692 = vmatmul.mubr.f32.gmra.mrb[26].mxu0 %v259_v3  ;;  %1622 = vmatprep.subr.bf16.mxu1 %v1621_v0  ;;  %v529_v0 = vlaneseq }
  0xce   : > { %1014 = vmatmul.mubr.f32.gmra.mrb[26].mxu1 %v259_v3  ;;  %1496 = vmatpush1.bf16.msra.mxu0 %v1495_v4  ;;  %v527_v3 = vld [vmem:[%s2400_s2] sm:$0xf] }
  0xcf   : > { %1624 = vmatpush1.bf16.msra.mxu1 %v1623_v7  ;;  %697 = vmatprep.mubr.f32.mxu0 %v264_v10  ;;  %v530_v1 = vshrl.u32 %v529_v0, 7 }
  0xd0   : > { %1019 = vmatprep.mubr.f32.mxu1 %v264_v10  ;;  %1498 = vmatprep.subr.bf16.mxu0 %v1497_v11 }
  0xd1   : > { %698 = vmatmul.mubr.f32.gmra.mrb[28].mxu0 %v263_v17  ;;  %1626 = vmatprep.subr.bf16.mxu1 %v1625_v14  ;;  %v531_v2 = vsub.s32 0, %v530_v1  ;;  %v539_v4 = vsub.s32 2, %v530_v1  ;;  %v535_v5 = vsub.s32 1, %v530_v1  ;;  %v543_v6 = vsub.s32 3, %v530_v1 }
  0xd2   : > { %1020 = vmatmul.mubr.f32.gmra.mrb[28].mxu1 %v263_v17  ;;  %1500 = vmatpush1.bf16.msra.mxu0 %v1499_v18 }
  0xd3   : > { %1628 = vmatpush1.bf16.msra.mxu1 %v1627_v21  ;;  %703 = vmatprep.mubr.f32.mxu0 %v268_v24  ;;  %v2207_v7 = vrot.slane %v527_v3, %v531_v2  ;;  %v2209_v8 = vrot.slane %v527_v3, %v539_v4  ;;  %v2211_v9 = vrot.slane %v527_v3, %v535_v5 }
  0xd4   : > { %1025 = vmatprep.mubr.f32.mxu1 %v268_v24  ;;  %1502 = vmatprep.subr.bf16.mxu0 %v1501_v25  ;;  %v2213_v10 = vrot.slane %v527_v3, %v543_v6 }
  0xd5   : > { %704 = vmatmul.mubr.f32.gmra.mrb[30].mxu0 %v267_v29  ;;  %1630 = vmatprep.subr.bf16.mxu1 %v1629_v28 }
  0xd6   : > { %1026 = vmatmul.mubr.f32.gmra.mrb[30].mxu1 %v267_v29  ;;  %1504 = vmatpush1.bf16.msra.mxu0 %v1503_v30 }
  0xd7   : > { %1632 = vmatpush1.bf16.msra.mxu1 %v1631_v31  ;;  %774 = vmatprep.mubr.f32.mxu0 %v210_v32 }
  0xd8   : > { %1096 = vmatprep.mubr.f32.mxu1 %v210_v32 }
  0xd9   : > { %775 = vmatmul.mubr.f32.vlgmr.msra.gmra.mrb[0].mxu0 %v209_v33 }
  0xda   : > { %1097 = vmatmul.mubr.f32.vlgmr.msra.gmra.mrb[0].mxu1 %v209_v33  ;;  %780 = vmatprep.mubr.f32.mxu0 %v214_v34 }
  0xdb   : > { %1102 = vmatprep.mubr.f32.mxu1 %v214_v34 }
  0xdd   : > { %781 = vmatmul.mubr.f32.gmra.mrb[2].mxu0 %v213_v35 }
  0xde   : > { %1103 = vmatmul.mubr.f32.gmra.mrb[2].mxu1 %v213_v35  ;;  %786 = vmatprep.mubr.f32.mxu0 %v218_v36 }
  0xdf   : > { %1108 = vmatprep.mubr.f32.mxu1 %v218_v36 }
  0xe1   : > { %787 = vmatmul.mubr.f32.gmra.mrb[4].mxu0 %v217_v37 }
  0xe2   : > { %1109 = vmatmul.mubr.f32.gmra.mrb[4].mxu1 %v217_v37  ;;  %792 = vmatprep.mubr.f32.mxu0 %v222_v38 }
  0xe3   : > { %1114 = vmatprep.mubr.f32.mxu1 %v222_v38 }
  0xe5   : > { %793 = vmatmul.mubr.f32.gmra.mrb[6].mxu0 %v221_v39 }
  0xe6   : > { %1115 = vmatmul.mubr.f32.gmra.mrb[6].mxu1 %v221_v39  ;;  %798 = vmatprep.mubr.f32.mxu0 %v226_v40 }
  0xe7   : > { %1120 = vmatprep.mubr.f32.mxu1 %v226_v40 }
  0xe9   : > { %799 = vmatmul.mubr.f32.gmra.mrb[8].mxu0 %v225_v41 }
  0xea   : > { %1121 = vmatmul.mubr.f32.gmra.mrb[8].mxu1 %v225_v41  ;;  %804 = vmatprep.mubr.f32.mxu0 %v230_v42 }
  0xeb   : > { %1126 = vmatprep.mubr.f32.mxu1 %v230_v42 }
  0xed   : > { %805 = vmatmul.mubr.f32.gmra.mrb[10].mxu0 %v229_v43 }
  0xee   : > { %1127 = vmatmul.mubr.f32.gmra.mrb[10].mxu1 %v229_v43  ;;  %810 = vmatprep.mubr.f32.mxu0 %v234_v44 }
  0xef   : > { %1132 = vmatprep.mubr.f32.mxu1 %v234_v44 }
  0xf1   : > { %811 = vmatmul.mubr.f32.gmra.mrb[12].mxu0 %v233_v45 }
  0xf2   : > { %1133 = vmatmul.mubr.f32.gmra.mrb[12].mxu1 %v233_v45  ;;  %816 = vmatprep.mubr.f32.mxu0 %v238_v46 }
  0xf3   : > { %1138 = vmatprep.mubr.f32.mxu1 %v238_v46 }
  0xf5   : > { %817 = vmatmul.mubr.f32.gmra.mrb[14].mxu0 %v237_v47 }
  0xf6   : > { %1139 = vmatmul.mubr.f32.gmra.mrb[14].mxu1 %v237_v47  ;;  %822 = vmatprep.mubr.f32.mxu0 %v242_v48 }
  0xf7   : > { %1144 = vmatprep.mubr.f32.mxu1 %v242_v48 }
  0xf9   : > { %823 = vmatmul.mubr.f32.gmra.mrb[16].mxu0 %v241_v49 }
  0xfa   : > { %1145 = vmatmul.mubr.f32.gmra.mrb[16].mxu1 %v241_v49  ;;  %828 = vmatprep.mubr.f32.mxu0 %v246_v50 }
  0xfb   : > { %1150 = vmatprep.mubr.f32.mxu1 %v246_v50 }
  0xfd   : > { %829 = vmatmul.mubr.f32.gmra.mrb[18].mxu0 %v245_v51 }
  0xfe   : > { %1151 = vmatmul.mubr.f32.gmra.mrb[18].mxu1 %v245_v51  ;;  %834 = vmatprep.mubr.f32.mxu0 %v250_v52 }
  0xff   : > { %1156 = vmatprep.mubr.f32.mxu1 %v250_v52 }
 0x101   : > { %835 = vmatmul.mubr.f32.gmra.mrb[20].mxu0 %v249_v53 }
 0x102   : > { %1157 = vmatmul.mubr.f32.gmra.mrb[20].mxu1 %v249_v53  ;;  %840 = vmatprep.mubr.f32.mxu0 %v254_v54 }
 0x103   : > { %1162 = vmatprep.mubr.f32.mxu1 %v254_v54 }
 0x105   : > { %841 = vmatmul.mubr.f32.gmra.mrb[22].mxu0 %v253_v55 }
 0x106   : > { %1163 = vmatmul.mubr.f32.gmra.mrb[22].mxu1 %v253_v55  ;;  %846 = vmatprep.mubr.f32.mxu0 %v258_v56 }
 0x107   : > { %1168 = vmatprep.mubr.f32.mxu1 %v258_v56 }
 0x109   : > { %847 = vmatmul.mubr.f32.gmra.mrb[24].mxu0 %v257_v57 }
 0x10a   : > { %1169 = vmatmul.mubr.f32.gmra.mrb[24].mxu1 %v257_v57  ;;  %852 = vmatprep.mubr.f32.mxu0 %v262_v58 }
 0x10b   : > { %1174 = vmatprep.mubr.f32.mxu1 %v262_v58 }
 0x10d   : > { %853 = vmatmul.mubr.f32.gmra.mrb[26].mxu0 %v261_v59 }
 0x10e   : > { %1175 = vmatmul.mubr.f32.gmra.mrb[26].mxu1 %v261_v59  ;;  %858 = vmatprep.mubr.f32.mxu0 %v266_v60 }
 0x10f   : > { %1180 = vmatprep.mubr.f32.mxu1 %v266_v60 }
 0x111   : > { %859 = vmatmul.mubr.f32.gmra.mrb[28].mxu0 %v265_v61 }
 0x112   : > { %1181 = vmatmul.mubr.f32.gmra.mrb[28].mxu1 %v265_v61  ;;  %864 = vmatprep.mubr.f32.mxu0 %v270_v62 }
 0x113   : > { %1186 = vmatprep.mubr.f32.mxu1 %v270_v62 }
 0x115   : > { %865 = vmatmul.mubr.f32.gmra.mrb[30].mxu0 %v269_v63 }
 0x116   : > { %1187 = vmatmul.mubr.f32.gmra.mrb[30].mxu1 %v269_v63 }
 0x1ac   : > { %v776_v11 = vpop.f32.mrb[0].mxu0 }
 0x1ad   : > { %v1633_v12 = vadd.f32 %v776_v11, %v2207_v7  ;;  %v1098_v13 = vpop.f32.mrb[0].mxu1  ;;  %v778_v14 = vpop.f32.mrb[1].mxu0 }
 0x1ae   : > { %v1665_v15 = vadd.f32 %v1098_v13, %v2209_v8  ;;  %v1634_v16 = vadd.f32 %v778_v14, %v2211_v9  ;;  %v1100_v17 = vpop.f32.mrb[1].mxu1 }
 0x1af   : > { %1193 = vst [vmem:[%s2220_s8] sm:$0xff] %v1633_v12  ;;  %v1666_v18 = vadd.f32 %v1100_v17, %v2213_v10 }
 0x1b0   : > { %1195 = vst [vmem:[%s2220_s8 + $0x10] sm:$0xff] %v1665_v15  ;;  %1194 = vst [vmem:[%s2220_s8 + $0x8] sm:$0xff] %v1634_v16  ;;  %v782_v19 = vpop.f32.mrb[2].mxu0 }
 0x1b1   : > { %1196 = vst [vmem:[%s2220_s8 + $0x18] sm:$0xff] %v1666_v18  ;;  %v1635_v20 = vadd.f32 %v782_v19, %v2207_v7  ;;  %v1104_v21 = vpop.f32.mrb[2].mxu1  ;;  %v784_v22 = vpop.f32.mrb[3].mxu0 }
 0x1b2   : > { %v1667_v23 = vadd.f32 %v1104_v21, %v2209_v8  ;;  %v1636_v24 = vadd.f32 %v784_v22, %v2211_v9  ;;  %v1106_v25 = vpop.f32.mrb[3].mxu1 }
 0x1b3   : > { %1197 = vst [vmem:[%s2220_s8 + $0x20] sm:$0xff] %v1635_v20  ;;  %v1668_v26 = vadd.f32 %v1106_v25, %v2213_v10 }
 0x1b4   : > { %1199 = vst [vmem:[%s2220_s8 + $0x30] sm:$0xff] %v1667_v23  ;;  %1198 = vst [vmem:[%s2220_s8 + $0x28] sm:$0xff] %v1636_v24  ;;  %v788_v27 = vpop.f32.mrb[4].mxu0 }
 0x1b5   : > { %1200 = vst [vmem:[%s2220_s8 + $0x38] sm:$0xff] %v1668_v26  ;;  %v1637_v28 = vadd.f32 %v788_v27, %v2207_v7  ;;  %v1110_v29 = vpop.f32.mrb[4].mxu1  ;;  %v790_v30 = vpop.f32.mrb[5].mxu0 }
 0x1b6   : > { %v1669_v31 = vadd.f32 %v1110_v29, %v2209_v8  ;;  %v1638_v32 = vadd.f32 %v790_v30, %v2211_v9  ;;  %v1112_v33 = vpop.f32.mrb[5].mxu1 }
 0x1b7   : > { %1201 = vst [vmem:[%s2220_s8 + $0x40] sm:$0xff] %v1637_v28  ;;  %v1670_v34 = vadd.f32 %v1112_v33, %v2213_v10 }
 0x1b8   : > { %1203 = vst [vmem:[%s2220_s8 + $0x50] sm:$0xff] %v1669_v31  ;;  %1202 = vst [vmem:[%s2220_s8 + $0x48] sm:$0xff] %v1638_v32  ;;  %v794_v35 = vpop.f32.mrb[6].mxu0 }
 0x1b9   : > { %1204 = vst [vmem:[%s2220_s8 + $0x58] sm:$0xff] %v1670_v34  ;;  %v1639_v36 = vadd.f32 %v794_v35, %v2207_v7  ;;  %v1116_v37 = vpop.f32.mrb[6].mxu1  ;;  %v796_v38 = vpop.f32.mrb[7].mxu0 }
 0x1ba   : > { %v1671_v39 = vadd.f32 %v1116_v37, %v2209_v8  ;;  %v1640_v40 = vadd.f32 %v796_v38, %v2211_v9  ;;  %v1118_v41 = vpop.f32.mrb[7].mxu1 }
 0x1bb   : > { %1205 = vst [vmem:[%s2220_s8 + $0x60] sm:$0xff] %v1639_v36  ;;  %v1672_v42 = vadd.f32 %v1118_v41, %v2213_v10 }
 0x1bc   : > { %1207 = vst [vmem:[%s2220_s8 + $0x70] sm:$0xff] %v1671_v39  ;;  %1206 = vst [vmem:[%s2220_s8 + $0x68] sm:$0xff] %v1640_v40  ;;  %v800_v43 = vpop.f32.mrb[8].mxu0 }
 0x1bd   : > { %1208 = vst [vmem:[%s2220_s8 + $0x78] sm:$0xff] %v1672_v42  ;;  %v1641_v44 = vadd.f32 %v800_v43, %v2207_v7  ;;  %v1122_v45 = vpop.f32.mrb[8].mxu1  ;;  %v802_v46 = vpop.f32.mrb[9].mxu0 }
 0x1be   : > { %v1673_v47 = vadd.f32 %v1122_v45, %v2209_v8  ;;  %v1642_v48 = vadd.f32 %v802_v46, %v2211_v9  ;;  %v1124_v49 = vpop.f32.mrb[9].mxu1 }
 0x1bf   : > { %1209 = vst [vmem:[%s2220_s8 + $0x80] sm:$0xff] %v1641_v44  ;;  %v1674_v50 = vadd.f32 %v1124_v49, %v2213_v10 }
 0x1c0   : > { %1211 = vst [vmem:[%s2220_s8 + $0x90] sm:$0xff] %v1673_v47  ;;  %1210 = vst [vmem:[%s2220_s8 + $0x88] sm:$0xff] %v1642_v48  ;;  %v806_v51 = vpop.f32.mrb[10].mxu0 }
 0x1c1   : > { %1212 = vst [vmem:[%s2220_s8 + $0x98] sm:$0xff] %v1674_v50  ;;  %v1643_v52 = vadd.f32 %v806_v51, %v2207_v7  ;;  %v1128_v53 = vpop.f32.mrb[10].mxu1  ;;  %v808_v54 = vpop.f32.mrb[11].mxu0 }
 0x1c2   : > { %v1675_v55 = vadd.f32 %v1128_v53, %v2209_v8  ;;  %v1644_v56 = vadd.f32 %v808_v54, %v2211_v9  ;;  %v1130_v57 = vpop.f32.mrb[11].mxu1 }
 0x1c3   : > { %1213 = vst [vmem:[%s2220_s8 + $0xa0] sm:$0xff] %v1643_v52  ;;  %v1676_v58 = vadd.f32 %v1130_v57, %v2213_v10 }
 0x1c4   : > { %1215 = vst [vmem:[%s2220_s8 + $0xb0] sm:$0xff] %v1675_v55  ;;  %1214 = vst [vmem:[%s2220_s8 + $0xa8] sm:$0xff] %v1644_v56  ;;  %v812_v59 = vpop.f32.mrb[12].mxu0 }
 0x1c5   : > { %1216 = vst [vmem:[%s2220_s8 + $0xb8] sm:$0xff] %v1676_v58  ;;  %v1645_v60 = vadd.f32 %v812_v59, %v2207_v7  ;;  %v1134_v61 = vpop.f32.mrb[12].mxu1  ;;  %v814_v62 = vpop.f32.mrb[13].mxu0 }
 0x1c6   : > { %v1677_v63 = vadd.f32 %v1134_v61, %v2209_v8  ;;  %v1646_v0 = vadd.f32 %v814_v62, %v2211_v9  ;;  %v1136_v1 = vpop.f32.mrb[13].mxu1 }
 0x1c7   : > { %1217 = vst [vmem:[%s2220_s8 + $0xc0] sm:$0xff] %v1645_v60  ;;  %v1678_v2 = vadd.f32 %v1136_v1, %v2213_v10 }
 0x1c8   : > { %1219 = vst [vmem:[%s2220_s8 + $0xd0] sm:$0xff] %v1677_v63  ;;  %1218 = vst [vmem:[%s2220_s8 + $0xc8] sm:$0xff] %v1646_v0  ;;  %v818_v3 = vpop.f32.mrb[14].mxu0 }
 0x1c9   : > { %1220 = vst [vmem:[%s2220_s8 + $0xd8] sm:$0xff] %v1678_v2  ;;  %v1647_v4 = vadd.f32 %v818_v3, %v2207_v7  ;;  %v1140_v5 = vpop.f32.mrb[14].mxu1  ;;  %v820_v6 = vpop.f32.mrb[15].mxu0 }
 0x1ca   : > { %v1679_v11 = vadd.f32 %v1140_v5, %v2209_v8  ;;  %v1648_v12 = vadd.f32 %v820_v6, %v2211_v9  ;;  %v1142_v13 = vpop.f32.mrb[15].mxu1 }
 0x1cb   : > { %1221 = vst [vmem:[%s2220_s8 + $0xe0] sm:$0xff] %v1647_v4  ;;  %v1680_v14 = vadd.f32 %v1142_v13, %v2213_v10 }
 0x1cc   : > { %1223 = vst [vmem:[%s2220_s8 + $0xf0] sm:$0xff] %v1679_v11  ;;  %1222 = vst [vmem:[%s2220_s8 + $0xe8] sm:$0xff] %v1648_v12  ;;  %v824_v15 = vpop.f32.mrb[16].mxu0 }
 0x1cd   : > { %1224 = vst [vmem:[%s2220_s8 + $0xf8] sm:$0xff] %v1680_v14  ;;  %v1649_v16 = vadd.f32 %v824_v15, %v2207_v7  ;;  %v1146_v17 = vpop.f32.mrb[16].mxu1  ;;  %v826_v18 = vpop.f32.mrb[17].mxu0 }
 0x1ce   : > { %v1681_v19 = vadd.f32 %v1146_v17, %v2209_v8  ;;  %v1650_v20 = vadd.f32 %v826_v18, %v2211_v9  ;;  %v1148_v21 = vpop.f32.mrb[17].mxu1 }
 0x1cf   : > { %1225 = vst [vmem:[%s2220_s8 + $0x100] sm:$0xff] %v1649_v16  ;;  %v1682_v22 = vadd.f32 %v1148_v21, %v2213_v10 }
 0x1d0   : > { %1227 = vst [vmem:[%s2220_s8 + $0x110] sm:$0xff] %v1681_v19  ;;  %1226 = vst [vmem:[%s2220_s8 + $0x108] sm:$0xff] %v1650_v20  ;;  %v830_v23 = vpop.f32.mrb[18].mxu0 }
 0x1d1   : > { %1228 = vst [vmem:[%s2220_s8 + $0x118] sm:$0xff] %v1682_v22  ;;  %v1651_v24 = vadd.f32 %v830_v23, %v2207_v7  ;;  %v1152_v25 = vpop.f32.mrb[18].mxu1  ;;  %v832_v26 = vpop.f32.mrb[19].mxu0 }
 0x1d2   : > { %v1683_v27 = vadd.f32 %v1152_v25, %v2209_v8  ;;  %v1652_v28 = vadd.f32 %v832_v26, %v2211_v9  ;;  %v1154_v29 = vpop.f32.mrb[19].mxu1 }
 0x1d3   : > { %1229 = vst [vmem:[%s2220_s8 + $0x120] sm:$0xff] %v1651_v24  ;;  %v1684_v30 = vadd.f32 %v1154_v29, %v2213_v10 }
 0x1d4   : > { %1231 = vst [vmem:[%s2220_s8 + $0x130] sm:$0xff] %v1683_v27  ;;  %1230 = vst [vmem:[%s2220_s8 + $0x128] sm:$0xff] %v1652_v28  ;;  %v836_v31 = vpop.f32.mrb[20].mxu0 }
 0x1d5   : > { %1232 = vst [vmem:[%s2220_s8 + $0x138] sm:$0xff] %v1684_v30  ;;  %v1653_v32 = vadd.f32 %v836_v31, %v2207_v7  ;;  %v1158_v33 = vpop.f32.mrb[20].mxu1  ;;  %v838_v34 = vpop.f32.mrb[21].mxu0 }
 0x1d6   : > { %v1685_v35 = vadd.f32 %v1158_v33, %v2209_v8  ;;  %v1654_v36 = vadd.f32 %v838_v34, %v2211_v9  ;;  %v1160_v37 = vpop.f32.mrb[21].mxu1 }
 0x1d7   : > { %1233 = vst [vmem:[%s2220_s8 + $0x140] sm:$0xff] %v1653_v32  ;;  %v1686_v38 = vadd.f32 %v1160_v37, %v2213_v10 }
 0x1d8   : > { %1235 = vst [vmem:[%s2220_s8 + $0x150] sm:$0xff] %v1685_v35  ;;  %1234 = vst [vmem:[%s2220_s8 + $0x148] sm:$0xff] %v1654_v36  ;;  %v842_v39 = vpop.f32.mrb[22].mxu0 }
 0x1d9   : > { %1236 = vst [vmem:[%s2220_s8 + $0x158] sm:$0xff] %v1686_v38  ;;  %v1655_v40 = vadd.f32 %v842_v39, %v2207_v7  ;;  %v1164_v41 = vpop.f32.mrb[22].mxu1  ;;  %v844_v42 = vpop.f32.mrb[23].mxu0 }
 0x1da   : > { %v1687_v43 = vadd.f32 %v1164_v41, %v2209_v8  ;;  %v1656_v44 = vadd.f32 %v844_v42, %v2211_v9  ;;  %v1166_v45 = vpop.f32.mrb[23].mxu1 }
 0x1db   : > { %1237 = vst [vmem:[%s2220_s8 + $0x160] sm:$0xff] %v1655_v40  ;;  %v1688_v46 = vadd.f32 %v1166_v45, %v2213_v10 }
 0x1dc   : > { %1239 = vst [vmem:[%s2220_s8 + $0x170] sm:$0xff] %v1687_v43  ;;  %1238 = vst [vmem:[%s2220_s8 + $0x168] sm:$0xff] %v1656_v44  ;;  %v848_v47 = vpop.f32.mrb[24].mxu0 }
 0x1dd   : > { %1240 = vst [vmem:[%s2220_s8 + $0x178] sm:$0xff] %v1688_v46  ;;  %v1657_v48 = vadd.f32 %v848_v47, %v2207_v7  ;;  %v1170_v49 = vpop.f32.mrb[24].mxu1  ;;  %v850_v50 = vpop.f32.mrb[25].mxu0 }
 0x1de   : > { %v1689_v51 = vadd.f32 %v1170_v49, %v2209_v8  ;;  %v1658_v52 = vadd.f32 %v850_v50, %v2211_v9  ;;  %v1172_v53 = vpop.f32.mrb[25].mxu1 }
 0x1df   : > { %1241 = vst [vmem:[%s2220_s8 + $0x180] sm:$0xff] %v1657_v48  ;;  %v1690_v54 = vadd.f32 %v1172_v53, %v2213_v10 }
 0x1e0   : > { %1243 = vst [vmem:[%s2220_s8 + $0x190] sm:$0xff] %v1689_v51  ;;  %1242 = vst [vmem:[%s2220_s8 + $0x188] sm:$0xff] %v1658_v52  ;;  %v854_v55 = vpop.f32.mrb[26].mxu0 }
 0x1e1   : > { %1244 = vst [vmem:[%s2220_s8 + $0x198] sm:$0xff] %v1690_v54  ;;  %v1659_v56 = vadd.f32 %v854_v55, %v2207_v7  ;;  %v1176_v57 = vpop.f32.mrb[26].mxu1  ;;  %v856_v58 = vpop.f32.mrb[27].mxu0 }
 0x1e2   : > { %v1691_v59 = vadd.f32 %v1176_v57, %v2209_v8  ;;  %v1660_v60 = vadd.f32 %v856_v58, %v2211_v9  ;;  %v1178_v61 = vpop.f32.mrb[27].mxu1 }
 0x1e3   : > { %1245 = vst [vmem:[%s2220_s8 + $0x1a0] sm:$0xff] %v1659_v56  ;;  %v1692_v62 = vadd.f32 %v1178_v61, %v2213_v10 }
 0x1e4   : > { %1247 = vst [vmem:[%s2220_s8 + $0x1b0] sm:$0xff] %v1691_v59  ;;  %1246 = vst [vmem:[%s2220_s8 + $0x1a8] sm:$0xff] %v1660_v60  ;;  %v860_v63 = vpop.f32.mrb[28].mxu0 }
 0x1e5   : > { %1248 = vst [vmem:[%s2220_s8 + $0x1b8] sm:$0xff] %v1692_v62  ;;  %v1661_v0 = vadd.f32 %v860_v63, %v2207_v7  ;;  %v1182_v1 = vpop.f32.mrb[28].mxu1  ;;  %v862_v2 = vpop.f32.mrb[29].mxu0 }
 0x1e6   : > { %v1693_v3 = vadd.f32 %v1182_v1, %v2209_v8  ;;  %v1662_v4 = vadd.f32 %v862_v2, %v2211_v9  ;;  %v1184_v5 = vpop.f32.mrb[29].mxu1 }
 0x1e7   : > { %1249 = vst [vmem:[%s2220_s8 + $0x1c0] sm:$0xff] %v1661_v0  ;;  %v1694_v6 = vadd.f32 %v1184_v5, %v2213_v10 }
 0x1e8   : > { %1251 = vst [vmem:[%s2220_s8 + $0x1d0] sm:$0xff] %v1693_v3  ;;  %1250 = vst [vmem:[%s2220_s8 + $0x1c8] sm:$0xff] %v1662_v4  ;;  %v866_v11 = vpop.f32.mrb[30].mxu0 }
 0x1e9   : > { %1252 = vst [vmem:[%s2220_s8 + $0x1d8] sm:$0xff] %v1694_v6  ;;  %v1663_v12 = vadd.f32 %v866_v11, %v2207_v7  ;;  %v1188_v13 = vpop.f32.mrb[30].mxu1  ;;  %v868_v14 = vpop.f32.mrb[31].mxu0 }
 0x1ea   : > { %v1695_v15 = vadd.f32 %v1188_v13, %v2209_v8  ;;  %v1664_v16 = vadd.f32 %v868_v14, %v2211_v9  ;;  %v1190_v17 = vpop.f32.mrb[31].mxu1 }
 0x1eb   : > { %1253 = vst [vmem:[%s2220_s8 + $0x1e0] sm:$0xff] %v1663_v12  ;;  %v1696_v7 = vadd.f32 %v1190_v17, %v2213_v10 }
 0x1ec   : > { %1255 = vst [vmem:[%s2220_s8 + $0x1f0] sm:$0xff] %v1695_v15  ;;  %1254 = vst [vmem:[%s2220_s8 + $0x1e8] sm:$0xff] %v1664_v16 }
 0x1ed   : > { %1256 = vst [vmem:[%s2220_s8 + $0x1f8] sm:$0xff] %v1696_v7 }
 0x1ee   : > { %1893 = shalt.err (!%p1890_p7)
}
 0x1ef   : > { %s1894_s30 = scalar_lea.hbm %s2347_s5, 8192  ;;  %s1898_s10 = scalar_lea.hbm %s2401_s3, 16384 }
 0x1f0   : > { %p1895_p9 = scmp.ne.s32.totalorder %s2347_s5, %s1894_s30  ;;  %p1899_p5 = scmp.lt.u32.totalorder %s2347_s5, %s2401_s3 }
 0x1f1   : > { %p1900_p11 = scmp.lt.u32.totalorder %s1898_s10, %s1894_s30  ;;  %p1902_p4 = scmp.lt.u32.totalorder %s1894_s30, %s2347_s5 }
 0x1f2   : > { %p1896_p1 = pnand %p1895_p9, %p2073_p12 }
 0x1f3   : > { %p1901_p2 = por %p1900_p11, %p1899_p5 }
 0x1f4   : > { %p1897_p0 = pneg %p1896_p1 }
 0x1f5   : > { %p1903_p6 = por %p1902_p4, %p1901_p2 }
 0x1f7   : > { %p1904_p8 = pnand %p1903_p6, %p1897_p0 }
 0x1f9   : > { %1907 = shalt.err (!%p1904_p8)
}
 0x1fa   : > { %s1957_s20 = smov 512   ;;  %s1958_s8 = smov 32  }
 0x1fb   : > { %1767 = dma.vmem_to_hbm [thread:$0]  (%p2073_p12), %s2349_s4, 8192, %s2347_s5, %s1258_s11, %s1957_s20, %s1957_s20, %s1958_s8  }
 0x1fc PF: > { %s1287_s9 = sand.u32 1, %s1938_s12   ;;  %p2416_p10 = scmp.ne.s32.totalorder %s2406_s19, 0 }
 0x1fd   : > { %p2417_p13 = scmp.ge.s32.totalorder %s1950_s15, 2  ;;  %s1288_s16 = scalar_lea.sflag [#allocation4], %s1287_s9 }
 0x1ff   : > { %p1778_p3 = pnand %p2417_p13, %p2416_p10 }
 0x201   : > { %1933 = dma.done.wait (!%p1778_p3), %s1288_s16, 8192  }
 0x202   : > { %1935 = vsyncadd (!%p1778_p3), %s1288_s16, 4294959104  ;;  %p17_p7 = scmp.ge.s32.totalorder %s2035_s24, 4   ;;  %s2418_s12 = smov %s1942_s13 }
 0x203   : > { %s2419_s13 = smov %s1946_s14  ;;  %s2420_s14 = smov %s2069_s17 }
 0x204   : > { %s2421_s15 = smov %s2035_s24  ;;  %19 = sbr.rel (!%p17_p7) target bundleno = 6 (0x6), region = 81 }
 0x20b   :  { %1293 = vsyncpa [#allocation3], 1 }
 0x20c   :  { %1295 = vsyncpa [#allocation3 + $0x1], 1 }
 0x20d   :  { %1296 = vsyncpa [#allocation6], 1 }
 0x20e   :  { %1297 = vsyncpa [#allocation4], 1 }
 0x20f   :  { %1299 = vsyncpa [#allocation4 + $0x1], 1 }

</bundles_post_ra>
